<compile_context>
chip_gen: v5e
topology: v5e:2x2
jax: 0.10.0
libtpu: 0.0.40
codegen_flags: <defaults>
</compile_context>

<pallas_src>
import numpy as np
import jax
import jax.numpy as jnp
from jax.experimental import pallas as pl
from jax.experimental.pallas import tpu as pltpu


# ---------------------------------------------------------------------------
# Constant-matrix builders (glue; exact PyTorch semantics)
# ---------------------------------------------------------------------------
def _adaptive_pool_matrix(out_size, in_size):
    """Row-stochastic matrix implementing nn.AdaptiveAvgPool2d along one axis."""
    m = np.zeros((out_size, in_size), np.float32)
    for j in range(out_size):
        start = (j * in_size) // out_size
        end = -((-(j + 1) * in_size) // out_size)  # ceil((j+1)*in/out)
        m[j, start:end] = 1.0 / (end - start)
    return m


def _bilinear_matrix(out_size, in_size):
    """F.interpolate(mode='bilinear', align_corners=False) along one axis."""
    m = np.zeros((out_size, in_size), np.float32)
    if in_size == 1:
        m[:, 0] = 1.0
        return m
    scale = in_size / out_size
    for i in range(out_size):
        src = max((i + 0.5) * scale - 0.5, 0.0)
        i0 = min(int(np.floor(src)), in_size - 1)
        i1 = min(i0 + 1, in_size - 1)
        lam = src - float(i0)
        m[i, i0] += 1.0 - lam
        m[i, i1] += lam
    return m


# ---------------------------------------------------------------------------
# Pallas kernel: one batch tile per grid step
# ---------------------------------------------------------------------------
def _make_sppm_kernel(n_stages, blk, cmid, cout, R, kpad, batch_tile):
    def kernel(x_ref, mp_ref, mu9_ref, wc_ref, scale_ref, bias_ref, w3_ref,
               so_ref, bo_ref, o_ref, yw_ref):
        # MU9's pad columns are zero, but 0 * uninitialized-garbage can still be NaN, so
        # the scratch pad rows are zeroed.  Kept per-step (80x128 bf16, trivial) because
        # with a "parallel" batch axis each TensorCore owns its own scratch / id range.
        if kpad > 9 * R:
            yw_ref[9 * R:kpad, :] = jnp.zeros((kpad - 9 * R, cout), jnp.bfloat16)

        for bi in range(batch_tile):
            x = x_ref[bi]                                            # (HW, Cin) bf16

            # --- pyramid pooling: ONE stacked adaptive-pool matmul (x read once) ----
            pooled = jnp.dot(mp_ref[...], x, preferred_element_type=jnp.float32)
            pooled = pooled.astype(jnp.bfloat16)                     # (R, Cin)

            # --- all three 1x1 convs in ONE fat matmul; per-stage diagonal blocks ---
            y_all = jnp.dot(pooled, wc_ref[...],
                            preferred_element_type=jnp.float32)      # (R, S*Cmid)
            y = jnp.concatenate(
                [y_all[s * blk:(s + 1) * blk, s * cmid:(s + 1) * cmid]
                 for s in range(n_stages)], axis=0)                  # (R, Cmid) f32
            y = jnp.maximum(y * scale_ref[...] + bias_ref[...], 0.0)  # folded BN + ReLU
            y = y.astype(jnp.bfloat16)

            # --- all nine 3x3-conv taps in ONE matmul, scattered into YW scratch ----
            yw_all = jnp.dot(y, w3_ref[...],
                             preferred_element_type=jnp.float32)     # (R, 9*Cout)
            for tap in range(9):                                     # aligned slices
                yw_ref[tap * R:(tap + 1) * R, :] = (
                    yw_all[:, tap * cout:(tap + 1) * cout].astype(jnp.bfloat16))

            # --- fused bilinear-upsample + 3x3 conv: ONE (HW,Kpad)@(Kpad,Cout) push --
            conv = jnp.dot(mu9_ref[...], yw_ref[...],
                           preferred_element_type=jnp.float32)       # (HW, Cout) f32
            out = jnp.maximum(conv * so_ref[...] + bo_ref[...], 0.0)
            o_ref[bi] = out.astype(o_ref.dtype)

    return kernel


def _const_spec(a):
    # Constant operands: same block every grid step (fetched once, resident in VMEM).
    return pl.BlockSpec(a.shape, lambda b, _n=a.ndim: (0,) * _n)


def sppm_forward(x_nchw, params, bins, *, out_dtype=jnp.bfloat16, nchw=False,
                 batch_tile=1, vmem_limit_bytes=None):
    """SPPM forward.  x_nchw: (N, Cin, H, W) f32 (PyTorch layout).

    Returns NHWC (N, H, W, Cout) in `out_dtype` (default bf16, what the downstream UAFM
    consumes); pass `nchw=True, out_dtype=jnp.float32` for exact PyTorch-layout parity
    (adds an HBM transpose pass outside the kernel).
    """
    N, cin, H, W = x_nchw.shape
    cmid = params["wc"][0].shape[1]
    cout = params["w3"].shape[-1]
    HW = H * W
    n_stages = len(bins)
    assert N % batch_tile == 0
    blk = max(16, -(-max(b * b for b in bins) // 16) * 16)  # padded rows per stage
    R = n_stages * blk
    kpad = -(-9 * R // 128) * 128                           # lane-dense K for the conv

    # ---- pooling / fused upsample+conv constant matrices --------------------------
    MP = np.zeros((R, HW), np.float32)
    MU = np.zeros((HW, R), np.float32)
    for s, b in enumerate(bins):
        MP[s * blk:s * blk + b * b] = np.kron(_adaptive_pool_matrix(b, H),
                                              _adaptive_pool_matrix(b, W))
        MU[:, s * blk:s * blk + b * b] = np.kron(_bilinear_matrix(H, b),
                                                 _bilinear_matrix(W, b))
    # MU9[:, tap*R:(tap+1)*R] = Shift_tap @ MU with the conv's zero padding baked into
    # the shift (rows whose tap source pixel is out of bounds are zero).  The per-stage
    # padded columns of MU stay zero in every shifted copy, so the ReLU(bias) junk rows
    # of y never reach the accumulator.
    MU_img = MU.reshape(H, W, R)
    MU9 = np.zeros((HW, kpad), np.float32)
    for ky in range(3):
        for kx in range(3):
            dy, dx = ky - 1, kx - 1
            tap = ky * 3 + kx
            t = np.zeros((H, W, R), np.float32)
            h_lo, h_hi = max(0, -dy), min(H, H - dy)
            w_lo, w_hi = max(0, -dx), min(W, W - dx)
            t[h_lo:h_hi, w_lo:w_hi, :] = MU_img[h_lo + dy:h_hi + dy,
                                                w_lo + dx:w_hi + dx, :]
            MU9[:, tap * R:(tap + 1) * R] = t.reshape(HW, R)

    # ---- pack parameters (bf16 at matmul inputs; BN scale/bias stay f32) ----------
    mp = jnp.asarray(MP, jnp.bfloat16)
    mu9 = jnp.asarray(MU9, jnp.bfloat16)
    wc_all = jnp.concatenate(list(params["wc"]), axis=1).astype(jnp.bfloat16)  # (Cin, S*Cmid)
    scale_all = jnp.concatenate(
        [jnp.broadcast_to(params["sb"][s][0][None, :], (blk, cmid))
         for s in range(n_stages)], axis=0).astype(jnp.float32)                # (R, Cmid)
    bias_all = jnp.concatenate(
        [jnp.broadcast_to(params["sb"][s][1][None, :], (blk, cmid))
         for s in range(n_stages)], axis=0).astype(jnp.float32)                # (R, Cmid)
    w3cat = jnp.concatenate([params["w3"][t] for t in range(9)],
                            axis=1).astype(jnp.bfloat16)                       # (Cmid, 9*Cout)
    scale_o = params["sbo"][0][None, :].astype(jnp.float32)                    # (1, Cout)
    bias_o = params["sbo"][1][None, :].astype(jnp.float32)                     # (1, Cout)

    x = jnp.transpose(x_nchw, (0, 2, 3, 1)).reshape(N, HW, cin).astype(jnp.bfloat16)

    consts = [mp, mu9, wc_all, scale_all, bias_all, w3cat, scale_o, bias_o]
    in_specs = [pl.BlockSpec((batch_tile, HW, cin), lambda b: (b, 0, 0))]
    in_specs += [_const_spec(a) for a in consts]

    # ---- VMEM budget: double-buffered blocks/constants + scratch + headroom -------
    if vmem_limit_bytes is None:
        const_bytes = sum(int(a.size) * a.dtype.itemsize for a in consts)
        io_bytes = batch_tile * HW * (cin * 2 + cout * jnp.dtype(out_dtype).itemsize)
        vmem_limit_bytes = 2 * (const_bytes + io_bytes) + kpad * cout * 2 + (8 << 20)

    kernel = _make_sppm_kernel(n_stages, blk, cmid, cout, R, kpad, batch_tile)

    out = pl.pallas_call(
        kernel,
        out_shape=jax.ShapeDtypeStruct((N, HW, cout), out_dtype),
        grid_spec=pltpu.PrefetchScalarGridSpec(
            num_scalar_prefetch=0,
            grid=(N // batch_tile,),
            in_specs=in_specs,
            out_specs=pl.BlockSpec((batch_tile, HW, cout), lambda b: (b, 0, 0)),
            scratch_shapes=[pltpu.VMEM((kpad, cout), jnp.bfloat16)],
        ),
        compiler_params=pltpu.CompilerParams(
            dimension_semantics=("parallel",),        # batch shards across TCs on v7x
            vmem_limit_bytes=int(vmem_limit_bytes)),
    )(x, *consts)

    out = out.reshape(N, H, W, cout)
    if nchw:
        out = jnp.transpose(out, (0, 3, 1, 2))
    return out


# ---------------------------------------------------------------------------
# Pure-JAX reference (PyTorch-shaped math, bf16 quantization points) for correctness
# ---------------------------------------------------------------------------
def _q(a):
    """Round to bf16 and back to f32 (mirrors the kernel's bf16 compute dtype)."""
    return jnp.asarray(a, jnp.float32).astype(jnp.bfloat16).astype(jnp.float32)


def sppm_reference(x_nchw, params, bins):
    N, cin, H, W = x_nchw.shape
    cmid = params["wc"][0].shape[1]
    cout = params["w3"].shape[-1]
    x = _q(jnp.transpose(x_nchw, (0, 2, 3, 1)).reshape(N, H * W, cin))

    acc = jnp.zeros((N, H * W, cmid), jnp.float32)
    for s, b in enumerate(bins):
        mp = _q(np.kron(_adaptive_pool_matrix(b, H), _adaptive_pool_matrix(b, W)))
        mu = _q(np.kron(_bilinear_matrix(H, b), _bilinear_matrix(W, b)))
        pooled = _q(jnp.einsum("os,nsc->noc", mp, x))
        y = jnp.einsum("noc,cd->nod", pooled, _q(params["wc"][s]))
        y = y * params["sb"][s][0] + params["sb"][s][1]
        y = _q(jnp.maximum(y, 0.0))
        acc = acc + jnp.einsum("so,nod->nsd", mu, y)

    acc = _q(acc).reshape(N, H, W, cmid)
    padded = jnp.pad(acc, ((0, 0), (1, 1), (1, 1), (0, 0)))
    w3 = _q(params["w3"])
    out = jnp.zeros((N, H, W, cout), jnp.float32)
    for ky in range(3):
        for kx in range(3):
            out = out + jnp.einsum("nhwc,cd->nhwd",
                                   padded[:, ky:ky + H, kx:kx + W, :],
                                   w3[ky * 3 + kx])
    out = jnp.maximum(out * params["sbo"][0] + params["sbo"][1], 0.0)
    return jnp.transpose(out, (0, 3, 1, 2))


# ---------------------------------------------------------------------------
# Deterministic parameter construction (synthetic; no checkpoint load)
# ---------------------------------------------------------------------------
def init_params(key, cin, cmid, cout):
    ks = jax.random.split(key, 8)

    def bn_fold(k, c):
        kg, kb, km, kv = jax.random.split(k, 4)
        gamma = jax.random.uniform(kg, (c,), jnp.float32, 0.5, 1.5)
        beta = jax.random.uniform(kb, (c,), jnp.float32, -0.1, 0.1)
        mean = jax.random.uniform(km, (c,), jnp.float32, -0.1, 0.1)
        var = jax.random.uniform(kv, (c,), jnp.float32, 0.5, 1.5)
        scale = gamma / jnp.sqrt(var + 1e-5)
        bias = beta - mean * scale
        return jnp.stack([scale, bias], axis=0)  # (2, c)

    params = {"wc": [], "sb": []}
    for s in range(3):
        params["wc"].append(
            jax.random.normal(ks[s], (cin, cmid), jnp.float32) / np.sqrt(cin))
        params["sb"].append(bn_fold(ks[3 + s], cmid))
    params["w3"] = (jax.random.normal(ks[6], (9, cmid, cout), jnp.float32)
                    / np.sqrt(9 * cmid))                             # (ky*3+kx, Cmid, Cout)
    params["sbo"] = bn_fold(ks[7], cout)
    return params


if __name__ == "__main__":
    key = jax.random.PRNGKey(0)
    # SPPM in PP-LiteSeg is SPPM(1024, 128, 128) on the 1/32 feature map.  Keep the
    # batch / Cin / spatial dims small, but use the real decode width so the channel
    # (lane) layout is representative.
    N, Cin, H, W = 2, 64, 16, 16
    Cmid, Cout = 128, 128
    bins = (1, 2, 4)

    kx, kp = jax.random.split(key)
    x = jax.random.normal(kx, (N, Cin, H, W), jnp.float32)
    params = init_params(kp, Cin, Cmid, Cout)

    out = sppm_forward(x, params, bins)                  # (N, H, W, Cout) bf16, fast path
    out = jax.block_until_ready(out)
    assert out.shape == (N, H, W, Cout)

    ref = sppm_reference(x, params, bins)                # (N, Cout, H, W) f32
    ref_nhwc = jnp.transpose(ref, (0, 2, 3, 1))
    # Tolerance covers bf16 output + the mathematically-equivalent but differently
    # quantized MU9 factorization (sum_tap shift(MU@y)@w3 == sum_tap shift(MU)@(y@w3)).
    np.testing.assert_allclose(np.asarray(out.astype(jnp.float32)),
                               np.asarray(ref_nhwc), atol=5e-2, rtol=5e-2)
    print("KERNEL_OK")
</pallas_src>

<mosaic_0001>
module attributes {stable_mosaic.version = 11 : i64} {
  func.func @kernel(%arg0: i32, %arg1: memref<1x256x64xbf16, #tpu.memory_space<vmem>>, %arg2: memref<48x256xbf16, #tpu.memory_space<vmem>>, %arg3: memref<256x512xbf16, #tpu.memory_space<vmem>>, %arg4: memref<64x384xbf16, #tpu.memory_space<vmem>>, %arg5: memref<48x128xf32, #tpu.memory_space<vmem>>, %arg6: memref<48x128xf32, #tpu.memory_space<vmem>>, %arg7: memref<128x1152xbf16, #tpu.memory_space<vmem>>, %arg8: memref<1x128xf32, #tpu.memory_space<vmem>>, %arg9: memref<1x128xf32, #tpu.memory_space<vmem>>, %arg10: memref<1x256x128xbf16, #tpu.memory_space<vmem>>, %arg11: memref<512x128xbf16, #tpu.memory_space<vmem>>) attributes {dimension_semantics = [#tpu.dimension_semantics<parallel>], iteration_bounds = array<i64: 2>, scalar_prefetch = 0 : i64, scratch_operands = 1 : i64, tpu.core_type = #tpu.core_type<tc>, window_params = [{transform_indices = @transform_0, window_bounds = array<i64: 1, 256, 64>}, {pipeline_mode = #tpu.pipeline_mode<synchronous>, transform_indices = @transform_1, window_bounds = array<i64: 48, 256>}, {pipeline_mode = #tpu.pipeline_mode<synchronous>, transform_indices = @transform_2, window_bounds = array<i64: 256, 512>}, {pipeline_mode = #tpu.pipeline_mode<synchronous>, transform_indices = @transform_3, window_bounds = array<i64: 64, 384>}, {pipeline_mode = #tpu.pipeline_mode<synchronous>, transform_indices = @transform_4, window_bounds = array<i64: 48, 128>}, {pipeline_mode = #tpu.pipeline_mode<synchronous>, transform_indices = @transform_5, window_bounds = array<i64: 48, 128>}, {pipeline_mode = #tpu.pipeline_mode<synchronous>, transform_indices = @transform_6, window_bounds = array<i64: 128, 1152>}, {pipeline_mode = #tpu.pipeline_mode<synchronous>, transform_indices = @transform_7, window_bounds = array<i64: 1, 128>}, {pipeline_mode = #tpu.pipeline_mode<synchronous>, transform_indices = @transform_8, window_bounds = array<i64: 1, 128>}, {transform_indices = @transform_9, window_bounds = array<i64: 1, 256, 128>}]} {
    %cst = arith.constant 0.000000e+00 : bf16
    %0 = vector.broadcast %cst : bf16 to vector<80x128xbf16>
    %c432 = arith.constant 432 : index
    %c0 = arith.constant 0 : index
    %1 = vector.load %arg11[%c432, %c0] : memref<512x128xbf16, #tpu.memory_space<vmem>>, vector<80x128xbf16>
    tpu.vector_store %arg11[%c432, %c0], %0 {strides = array<i32>} : memref<512x128xbf16, #tpu.memory_space<vmem>>, vector<80x128xbf16>,
    %c0_0 = arith.constant 0 : index
    %c0_1 = arith.constant 0 : index
    %c0_2 = arith.constant 0 : index
    %2 = vector.load %arg1[%c0_0, %c0_1, %c0_2] : memref<1x256x64xbf16, #tpu.memory_space<vmem>>, vector<1x256x64xbf16>
    %3 = vector.shape_cast %2 : vector<1x256x64xbf16> to vector<256x64xbf16>
    %c0_3 = arith.constant 0 : index
    %c0_4 = arith.constant 0 : index
    %4 = vector.load %arg2[%c0_3, %c0_4] : memref<48x256xbf16, #tpu.memory_space<vmem>>, vector<48x256xbf16>
    %cst_5 = arith.constant dense<0.000000e+00> : vector<48x64xf32>
    %5 = tpu.matmul %4, %3, %cst_5 {dimension_numbers = #tpu.dot_dimension_numbers<[1], [0], [0], [1], [0, 0, 1, 1], [], []>} : vector<48x256xbf16>, vector<256x64xbf16>, vector<48x64xf32> -> vector<48x64xf32>
    %6 = arith.truncf %5 : vector<48x64xf32> to vector<48x64xbf16>
    %c0_6 = arith.constant 0 : index
    %c0_7 = arith.constant 0 : index
    %7 = vector.load %arg4[%c0_6, %c0_7] : memref<64x384xbf16, #tpu.memory_space<vmem>>, vector<64x384xbf16>
    %cst_8 = arith.constant dense<0.000000e+00> : vector<48x384xf32>
    %8 = tpu.matmul %6, %7, %cst_8 {dimension_numbers = #tpu.dot_dimension_numbers<[1], [0], [0], [1], [0, 0, 1, 1], [], []>} : vector<48x64xbf16>, vector<64x384xbf16>, vector<48x384xf32> -> vector<48x384xf32>
    %9 = vector.extract_strided_slice %8 {offsets = [0, 0], sizes = [16, 128], strides = [1, 1]} : vector<48x384xf32> to vector<16x128xf32>
    %10 = vector.extract_strided_slice %8 {offsets = [16, 128], sizes = [16, 128], strides = [1, 1]} : vector<48x384xf32> to vector<16x128xf32>
    %11 = vector.extract_strided_slice %8 {offsets = [32, 256], sizes = [16, 128], strides = [1, 1]} : vector<48x384xf32> to vector<16x128xf32>
    %12 = tpu.concatenate %9, %10, %11 in 0 : vector<16x128xf32>, vector<16x128xf32>, vector<16x128xf32> -> vector<48x128xf32>
    %c0_9 = arith.constant 0 : index
    %c0_10 = arith.constant 0 : index
    %13 = vector.load %arg5[%c0_9, %c0_10] : memref<48x128xf32, #tpu.memory_space<vmem>>, vector<48x128xf32>
    %14 = arith.mulf %12, %13 : vector<48x128xf32>
    %c0_11 = arith.constant 0 : index
    %c0_12 = arith.constant 0 : index
    %15 = vector.load %arg6[%c0_11, %c0_12] : memref<48x128xf32, #tpu.memory_space<vmem>>, vector<48x128xf32>
    %16 = arith.addf %14, %15 : vector<48x128xf32>
    %cst_13 = arith.constant 0.000000e+00 : f32
    %17 = vector.broadcast %cst_13 : f32 to vector<48x128xf32>
    %18 = arith.maximumf %16, %17 : vector<48x128xf32>
    %19 = arith.truncf %18 : vector<48x128xf32> to vector<48x128xbf16>
    %c0_14 = arith.constant 0 : index
    %c0_15 = arith.constant 0 : index
    %20 = vector.load %arg7[%c0_14, %c0_15] : memref<128x1152xbf16, #tpu.memory_space<vmem>>, vector<128x1152xbf16>
    %cst_16 = arith.constant dense<0.000000e+00> : vector<48x1152xf32>
    %21 = tpu.matmul %19, %20, %cst_16 {dimension_numbers = #tpu.dot_dimension_numbers<[1], [0], [0], [1], [0, 0, 1, 1], [], []>} : vector<48x128xbf16>, vector<128x1152xbf16>, vector<48x1152xf32> -> vector<48x1152xf32>
    %22 = vector.extract_strided_slice %21 {offsets = [0, 0], sizes = [48, 128], strides = [1, 1]} : vector<48x1152xf32> to vector<48x128xf32>
    %23 = arith.truncf %22 : vector<48x128xf32> to vector<48x128xbf16>
    %c0_17 = arith.constant 0 : index
    %c0_18 = arith.constant 0 : index
    %24 = vector.load %arg11[%c0_17, %c0_18] : memref<512x128xbf16, #tpu.memory_space<vmem>>, vector<48x128xbf16>
    tpu.vector_store %arg11[%c0_17, %c0_18], %23 {strides = array<i32>} : memref<512x128xbf16, #tpu.memory_space<vmem>>, vector<48x128xbf16>,
    %25 = vector.extract_strided_slice %21 {offsets = [0, 128], sizes = [48, 128], strides = [1, 1]} : vector<48x1152xf32> to vector<48x128xf32>
    %26 = arith.truncf %25 : vector<48x128xf32> to vector<48x128xbf16>
    %c48 = arith.constant 48 : index
    %c0_19 = arith.constant 0 : index
    %27 = vector.load %arg11[%c48, %c0_19] : memref<512x128xbf16, #tpu.memory_space<vmem>>, vector<48x128xbf16>
    tpu.vector_store %arg11[%c48, %c0_19], %26 {strides = array<i32>} : memref<512x128xbf16, #tpu.memory_space<vmem>>, vector<48x128xbf16>,
    %28 = vector.extract_strided_slice %21 {offsets = [0, 256], sizes = [48, 128], strides = [1, 1]} : vector<48x1152xf32> to vector<48x128xf32>
    %29 = arith.truncf %28 : vector<48x128xf32> to vector<48x128xbf16>
    %c96 = arith.constant 96 : index
    %c0_20 = arith.constant 0 : index
    %30 = vector.load %arg11[%c96, %c0_20] : memref<512x128xbf16, #tpu.memory_space<vmem>>, vector<48x128xbf16>
    tpu.vector_store %arg11[%c96, %c0_20], %29 {strides = array<i32>} : memref<512x128xbf16, #tpu.memory_space<vmem>>, vector<48x128xbf16>,
    %31 = vector.extract_strided_slice %21 {offsets = [0, 384], sizes = [48, 128], strides = [1, 1]} : vector<48x1152xf32> to vector<48x128xf32>
    %32 = arith.truncf %31 : vector<48x128xf32> to vector<48x128xbf16>
    %c144 = arith.constant 144 : index
    %c0_21 = arith.constant 0 : index
    %33 = vector.load %arg11[%c144, %c0_21] : memref<512x128xbf16, #tpu.memory_space<vmem>>, vector<48x128xbf16>
    tpu.vector_store %arg11[%c144, %c0_21], %32 {strides = array<i32>} : memref<512x128xbf16, #tpu.memory_space<vmem>>, vector<48x128xbf16>,
    %34 = vector.extract_strided_slice %21 {offsets = [0, 512], sizes = [48, 128], strides = [1, 1]} : vector<48x1152xf32> to vector<48x128xf32>
    %35 = arith.truncf %34 : vector<48x128xf32> to vector<48x128xbf16>
    %c192 = arith.constant 192 : index
    %c0_22 = arith.constant 0 : index
    %36 = vector.load %arg11[%c192, %c0_22] : memref<512x128xbf16, #tpu.memory_space<vmem>>, vector<48x128xbf16>
    tpu.vector_store %arg11[%c192, %c0_22], %35 {strides = array<i32>} : memref<512x128xbf16, #tpu.memory_space<vmem>>, vector<48x128xbf16>,
    %37 = vector.extract_strided_slice %21 {offsets = [0, 640], sizes = [48, 128], strides = [1, 1]} : vector<48x1152xf32> to vector<48x128xf32>
    %38 = arith.truncf %37 : vector<48x128xf32> to vector<48x128xbf16>
    %c240 = arith.constant 240 : index
    %c0_23 = arith.constant 0 : index
    %39 = vector.load %arg11[%c240, %c0_23] : memref<512x128xbf16, #tpu.memory_space<vmem>>, vector<48x128xbf16>
    tpu.vector_store %arg11[%c240, %c0_23], %38 {strides = array<i32>} : memref<512x128xbf16, #tpu.memory_space<vmem>>, vector<48x128xbf16>,
    %40 = vector.extract_strided_slice %21 {offsets = [0, 768], sizes = [48, 128], strides = [1, 1]} : vector<48x1152xf32> to vector<48x128xf32>
    %41 = arith.truncf %40 : vector<48x128xf32> to vector<48x128xbf16>
    %c288 = arith.constant 288 : index
    %c0_24 = arith.constant 0 : index
    %42 = vector.load %arg11[%c288, %c0_24] : memref<512x128xbf16, #tpu.memory_space<vmem>>, vector<48x128xbf16>
    tpu.vector_store %arg11[%c288, %c0_24], %41 {strides = array<i32>} : memref<512x128xbf16, #tpu.memory_space<vmem>>, vector<48x128xbf16>,
    %43 = vector.extract_strided_slice %21 {offsets = [0, 896], sizes = [48, 128], strides = [1, 1]} : vector<48x1152xf32> to vector<48x128xf32>
    %44 = arith.truncf %43 : vector<48x128xf32> to vector<48x128xbf16>
    %c336 = arith.constant 336 : index
    %c0_25 = arith.constant 0 : index
    %45 = vector.load %arg11[%c336, %c0_25] : memref<512x128xbf16, #tpu.memory_space<vmem>>, vector<48x128xbf16>
    tpu.vector_store %arg11[%c336, %c0_25], %44 {strides = array<i32>} : memref<512x128xbf16, #tpu.memory_space<vmem>>, vector<48x128xbf16>,
    %46 = vector.extract_strided_slice %21 {offsets = [0, 1024], sizes = [48, 128], strides = [1, 1]} : vector<48x1152xf32> to vector<48x128xf32>
    %47 = arith.truncf %46 : vector<48x128xf32> to vector<48x128xbf16>
    %c384 = arith.constant 384 : index
    %c0_26 = arith.constant 0 : index
    %48 = vector.load %arg11[%c384, %c0_26] : memref<512x128xbf16, #tpu.memory_space<vmem>>, vector<48x128xbf16>
    tpu.vector_store %arg11[%c384, %c0_26], %47 {strides = array<i32>} : memref<512x128xbf16, #tpu.memory_space<vmem>>, vector<48x128xbf16>,
    %c0_27 = arith.constant 0 : index
    %c0_28 = arith.constant 0 : index
    %49 = vector.load %arg3[%c0_27, %c0_28] : memref<256x512xbf16, #tpu.memory_space<vmem>>, vector<256x512xbf16>
    %c0_29 = arith.constant 0 : index
    %c0_30 = arith.constant 0 : index
    %50 = vector.load %arg11[%c0_29, %c0_30] : memref<512x128xbf16, #tpu.memory_space<vmem>>, vector<512x128xbf16>
    %cst_31 = arith.constant dense<0.000000e+00> : vector<256x128xf32>
    %51 = tpu.matmul %49, %50, %cst_31 {dimension_numbers = #tpu.dot_dimension_numbers<[1], [0], [0], [1], [0, 0, 1, 1], [], []>} : vector<256x512xbf16>, vector<512x128xbf16>, vector<256x128xf32> -> vector<256x128xf32>
    %c0_32 = arith.constant 0 : index
    %c0_33 = arith.constant 0 : index
    %52 = vector.load %arg8[%c0_32, %c0_33] : memref<1x128xf32, #tpu.memory_space<vmem>>, vector<1x128xf32>
    %53 = vector.broadcast %52 : vector<1x128xf32> to vector<256x128xf32>
    %54 = arith.mulf %51, %53 : vector<256x128xf32>
    %c0_34 = arith.constant 0 : index
    %c0_35 = arith.constant 0 : index
    %55 = vector.load %arg9[%c0_34, %c0_35] : memref<1x128xf32, #tpu.memory_space<vmem>>, vector<1x128xf32>
    %56 = vector.broadcast %55 : vector<1x128xf32> to vector<256x128xf32>
    %57 = arith.addf %54, %56 : vector<256x128xf32>
    %cst_36 = arith.constant 0.000000e+00 : f32
    %58 = vector.broadcast %cst_36 : f32 to vector<256x128xf32>
    %59 = arith.maximumf %57, %58 : vector<256x128xf32>
    %60 = arith.truncf %59 : vector<256x128xf32> to vector<256x128xbf16>
    %c0_37 = arith.constant 0 : index
    %c0_38 = arith.constant 0 : index
    %c0_39 = arith.constant 0 : index
    %61 = vector.load %arg10[%c0_37, %c0_38, %c0_39] : memref<1x256x128xbf16, #tpu.memory_space<vmem>>, vector<1x256x128xbf16>
    %62 = vector.shape_cast %61 : vector<1x256x128xbf16> to vector<256x128xbf16>
    %63 = vector.shape_cast %60 : vector<256x128xbf16> to vector<1x256x128xbf16>
    tpu.vector_store %arg10[%c0_37, %c0_38, %c0_39], %63 {strides = array<i32>} : memref<1x256x128xbf16, #tpu.memory_space<vmem>>, vector<1x256x128xbf16>,
    return
  }
  func.func @transform_0(%arg0: i32) -> (i32, i32, i32) {
    %c0_i32 = arith.constant 0 : i32
    %c0_i32_0 = arith.constant 0 : i32
    %c0_i32_1 = arith.constant 0 : i32
    return %arg0, %c0_i32, %c0_i32_0 : i32, i32, i32
  }
  func.func @transform_1(%arg0: i32) -> (i32, i32) {
    %c0_i32 = arith.constant 0 : i32
    %c0_i32_0 = arith.constant 0 : i32
    %c0_i32_1 = arith.constant 0 : i32
    return %c0_i32, %c0_i32_0 : i32, i32
  }
  func.func @transform_2(%arg0: i32) -> (i32, i32) {
    %c0_i32 = arith.constant 0 : i32
    %c0_i32_0 = arith.constant 0 : i32
    %c0_i32_1 = arith.constant 0 : i32
    return %c0_i32, %c0_i32_0 : i32, i32
  }
  func.func @transform_3(%arg0: i32) -> (i32, i32) {
    %c0_i32 = arith.constant 0 : i32
    %c0_i32_0 = arith.constant 0 : i32
    %c0_i32_1 = arith.constant 0 : i32
    return %c0_i32, %c0_i32_0 : i32, i32
  }
  func.func @transform_4(%arg0: i32) -> (i32, i32) {
    %c0_i32 = arith.constant 0 : i32
    %c0_i32_0 = arith.constant 0 : i32
    %c0_i32_1 = arith.constant 0 : i32
    return %c0_i32, %c0_i32_0 : i32, i32
  }
  func.func @transform_5(%arg0: i32) -> (i32, i32) {
    %c0_i32 = arith.constant 0 : i32
    %c0_i32_0 = arith.constant 0 : i32
    %c0_i32_1 = arith.constant 0 : i32
    return %c0_i32, %c0_i32_0 : i32, i32
  }
  func.func @transform_6(%arg0: i32) -> (i32, i32) {
    %c0_i32 = arith.constant 0 : i32
    %c0_i32_0 = arith.constant 0 : i32
    %c0_i32_1 = arith.constant 0 : i32
    return %c0_i32, %c0_i32_0 : i32, i32
  }
  func.func @transform_7(%arg0: i32) -> (i32, i32) {
    %c0_i32 = arith.constant 0 : i32
    %c0_i32_0 = arith.constant 0 : i32
    %c0_i32_1 = arith.constant 0 : i32
    return %c0_i32, %c0_i32_0 : i32, i32
  }
  func.func @transform_8(%arg0: i32) -> (i32, i32) {
    %c0_i32 = arith.constant 0 : i32
    %c0_i32_0 = arith.constant 0 : i32
    %c0_i32_1 = arith.constant 0 : i32
    return %c0_i32, %c0_i32_0 : i32, i32
  }
  func.func @transform_9(%arg0: i32) -> (i32, i32, i32) {
    %c0_i32 = arith.constant 0 : i32
    %c0_i32_0 = arith.constant 0 : i32
    %c0_i32_1 = arith.constant 0 : i32
    return %arg0, %c0_i32, %c0_i32_0 : i32, i32, i32
  }
}

</mosaic_0001>

<bundles_post_ra>
// kernel: tpu_custom_call.1
= control target key start
LH: loop header
LB: loop body
LE: loop exit
PB: predicated region body
PF: predicated region fallthrough
CT: control target
= control target key end

     0   :  { %s4858_s0 = inlined_call_operand.vmem [shape: bf16[2,256,64], index: 0, kind: input, shape index: {}]   ;;  %s4859_s1 = inlined_call_operand.vmem [shape: bf16[48,256], index: 1, kind: input, shape index: {}]   ;;  %s4860_s2 = inlined_call_operand.hbm [shape: bf16[256,512], index: 2, kind: input, shape index: {}]   ;;  %s4861_s3 = inlined_call_operand.vmem [shape: bf16[64,384], index: 3, kind: input, shape index: {}]   ;;  %s4862_s4 = inlined_call_operand.vmem [shape: f32[48,128], index: 4, kind: input, shape index: {}]   ;;  %s4863_s5 = inlined_call_operand.vmem [shape: f32[48,128], index: 5, kind: input, shape index: {}]   ;;  %s4864_s6 = inlined_call_operand.hbm [shape: bf16[128,1152], index: 6, kind: input, shape index: {}]   ;;  %s4865_s7 = inlined_call_operand.vmem [shape: f32[1,128], index: 7, kind: input, shape index: {}]   ;;  %s4866_s8 = inlined_call_operand.vmem [shape: f32[1,128], index: 8, kind: input, shape index: {}]   ;;  %s4867_s9 = inlined_call_operand.hbm [shape: bf16[2,256,128], index: 9, kind: output, shape index: {}]  }
   0x1   :  { %4868 = sst [smem:[#allocation12_spill]] %s4860_s2 }
   0x2   :  { %14 = vsyncpa [#allocation4], 0 }
   0x3   :  { %15 = vsyncpa [#allocation7], 0 }
   0x4   :  { %16 = vsyncpa [#allocation5], 0 }
   0x5   :  { %18 = vsyncpa [#allocation5 + $0x1], 0  ;;  %s4379_s30 = smov 0   ;;  %s4381_s10 = smov 0  }
   0x6   :  { %s4383_s11 = smov 0   ;;  %s4385_s12 = smov 0  }
   0x7 LB: > { %s4400_s13 = sadd.s32 4294967295, %s4318_s12   ;;  %s2810_s14 = sadd.s32 4294967294, %s4318_s12   ;;  %s4318_s12 = sphi %s4385_s12, %s4876_s12   ;;  %s4314_s11 = sphi %s4383_s11, %s4875_s11   ;;  %s4310_s10 = sphi %s4381_s10, %s4874_s10   ;;  %s4306_s30 = sphi %s4379_s30, %s4873_s30  }
   0x8   : > { %s4404_s15 = sadd.s32 1, %s4318_s12   ;;  %s225_s16 = sadd.s32 1, %s4314_s11 }
   0x9   : > { %s222_s17 = ssub.s32 %s4318_s12, %s4404_s15  ;;  %p235_p0 = scmp.ne.s32.totalorder %s4314_s11, %s4310_s10 }
   0xa   : > { %p223_p1 = scmp.eq.s32.totalorder %s222_s17, 0  ;;  %p236_p2 = scmp.eq.s32.totalorder %s4400_s13, 1 }
   0xb   : > { %p241_p3 = scmp.ne.s32.totalorder %s4310_s10, %s4306_s30  ;;  %p242_p4 = scmp.eq.s32.totalorder %s2810_s14, 1 }
   0xc   : > { %s4415_s18 = scalar_select %p223_p1, %s4314_s11, %s225_s16  }
   0xd   : > { %p4417_p5 = por %p236_p2, %p235_p0  ;;  %p4421_p6 = por %p242_p4, %p241_p3 }
   0xe   : > { %p2811_p7 = scmp.ge.s32.totalorder %s4318_s12, 1  ;;  %p249_p8 = scmp.lt.s32.totalorder %s4318_s12, 3 }
   0xf   : > { %p4140_p9 = scmp.eq.s32.totalorder %s4400_s13, 0  ;;  %s4872_s2 = sld [smem:[#allocation12_spill]] }
  0x10   : > { %p4428_p10 = pnand %p2811_p7, %p249_p8  ;;  %s4320_s25 = smov [#allocation3]  }
  0x11   : > { %s265_s26 = sshll.u32 %s4320_s25, 4  ;;  %s286_s29 = sshll.u32 %s4864_s6, 4  ;;  %s266_s26 = int_to_ptr.vmem [resolvable:$true] %s265_s26  ;;  %s287_s29 = int_to_ptr.hbm [resolvable:$true] %s286_s29 }
  0x12   : > { %p4129_p11 = pneg %p4428_p10  ;;  %s4321_s14 = smov 256  }
  0x13   : > { %s4322_s16 = smov 16   ;;  %s4323_s17 = smov [#allocation6]  }
  0x14   : > { %p4130_p12 = pnand %p4140_p9, %p4129_p11  ;;  %s288_s22 = sshll.u32 %s4323_s17, 4  ;;  %s289_s22 = int_to_ptr.vmem [resolvable:$true] %s288_s22 }
  0x15   : > { %s263_s24 = sshll.u32 %s4872_s2, 4  ;;  %s4324_s23 = smov 576   ;;  %s264_s24 = int_to_ptr.hbm [resolvable:$true] %s263_s24 }
  0x16   : > { %4132 = dma.hbm_to_vmem [thread:$0]  (!%p4130_p12), %s264_s24, 8192, %s266_s26, [#allocation4], %s4321_s14, %s4321_s14, %s4322_s16  }
  0x17   : > { %s4325_s2 = smov 36   ;;  %318 = sbr.rel (%p4428_p10) target bundleno = 1071 (0x42f), region = 56 }
  0x18   : > { %4135 = dma.hbm_to_vmem [thread:$0]  (!%p4130_p12), %s287_s29, 9216, %s289_s22, [#allocation7], %s4324_s23, %s4324_s23, %s4325_s2  }
  0x1c   : > { %4293 = dma.done.wait (%p4140_p9), [#allocation4], 8192  }
  0x1d   : > { %4295 = vsyncadd (%p4140_p9), [#allocation4], 4294959104 }
  0x1e   : > { %4297 = dma.done.wait (%p4140_p9), [#allocation7], 9216  }
  0x1f   : > { %4299 = vsyncadd (%p4140_p9), [#allocation7], 4294958080  ;;  %p360_p13 = scmp.lt.s32.totalorder %s4400_s13, 1  ;;  %v2823_v16 = vld [vmem:[%s4859_s1] sm:$0xf]  ;;  %vm671_vm0 = vcmask 523264  }
  0x20   : > { %v3661_v17 = vld [vmem:[%s4859_s1 + $0x4] sm:$0xf0]  ;;  %v3660_v18 = vld [vmem:[%s4859_s1 + $0x4] sm:$0xf]  ;;  %v2825_v19 = vld [vmem:[%s4859_s1 + $0x8] sm:$0xf0] }
  0x21   : > { %s361_s24 = scalar_select %p360_p13, %s4400_s13, 1  ;;  %v2824_v20 = vor.u32 %v3661_v17, %v2823_v16  ;;  %v2828_v21 = vor.u32 %v3660_v18, %v2825_v19  ;;  %v2947_v22 = vld [vmem:[%s4861_s3 + $0x48] sm:$0xf]  ;;  %v3676_v23 = vld [vmem:[%s4861_s3 + $0x50] sm:$0xf0] }
  0x22   : > { %v3675_v24 = vld [vmem:[%s4861_s3 + $0x4c] sm:$0xf]  ;;  %v2948_v25 = vor.u32 %v3676_v23, %v2947_v22  ;;  %v2949_v26 = vld [vmem:[%s4861_s3 + $0x54] sm:$0xf0]  ;;  %v2831_v28 = vld [vmem:[%s4859_s1 + $0x10] sm:$0xf] }
  0x23   : > { %s3643_s2 = sshll.u32 %s361_s24, 7  ;;  %v2952_v27 = vor.u32 %v3675_v24, %v2949_v26  ;;  %v3663_v29 = vld [vmem:[%s4859_s1 + $0x14] sm:$0xf0]  ;;  %v3662_v30 = vld [vmem:[%s4859_s1 + $0x14] sm:$0xf] }
  0x24   : > { %s364_s26 = scalar_lea.vmem %s4858_s0, %s3643_s2  ;;  %685 = vmatpush.bf16.msra.mxu2 %v2948_v25  ;;  %v2833_v31 = vld [vmem:[%s4859_s1 + $0x18] sm:$0xf0]  ;;  %v2832_v32 = vor.u32 %v3663_v29, %v2831_v28  ;;  %v2839_v34 = vld [vmem:[%s4859_s1 + $0x20] sm:$0xf]  ;;  %v3665_v35 = vld [vmem:[%s4859_s1 + $0x24] sm:$0xf0] }
  0x25   : > { %v3651_v0 = vld [vmem:[%s364_s26 + $0x38] sm:$0xff]  ;;  %v3650_v2 = vld [vmem:[%s364_s26 + $0x30] sm:$0xff]  ;;  %v3649_v4 = vld [vmem:[%s364_s26 + $0x28] sm:$0xff]  ;;  %705 = vmatpush.bf16.msra.mxu3 %v2952_v27  ;;  %v2836_v33 = vor.u32 %v3662_v30, %v2833_v31  ;;  %v2840_v38 = vor.u32 %v3665_v35, %v2839_v34  ;;  %s357_s2 = sand.u32 1, %s4310_s10  }
  0x26   : > { %v3659_v1 = vld [vmem:[%s364_s26 + $0x78] sm:$0xff]  ;;  %540 = vmatpush.bf16.msra.mxu0 %v3651_v0  ;;  %v3658_v3 = vld [vmem:[%s364_s26 + $0x70] sm:$0xff]  ;;  %v3657_v5 = vld [vmem:[%s364_s26 + $0x68] sm:$0xff]  ;;  %s2818_s25 = sshll.u32 %s357_s2, 7  ;;  %s2711_s16 = scalar_lea.sflag [#allocation5], %s357_s2 }
  0x27   : > { %564 = vmatpush.bf16.msra.mxu1 %v3659_v1  ;;  %v3648_v6 = vld [vmem:[%s364_s26 + $0x20] sm:$0xff]  ;;  %v3647_v8 = vld [vmem:[%s364_s26 + $0x18] sm:$0xff]  ;;  %v3646_v10 = vld [vmem:[%s364_s26 + $0x10] sm:$0xff]  ;;  %s4712_s21 = scalar_lea.vmem [#allocation8], %s2818_s25  ;;  %s4268_s25 = scalar_lea.hbm %s4867_s9, 256 }
  0x28   : > { %v3656_v7 = vld [vmem:[%s364_s26 + $0x60] sm:$0xff]  ;;  %v3655_v9 = vld [vmem:[%s364_s26 + $0x58] sm:$0xff]  ;;  %v3654_v11 = vld [vmem:[%s364_s26 + $0x50] sm:$0xff] }
  0x29   : > { %v3645_v12 = vld [vmem:[%s364_s26 + $0x8] sm:$0xff]  ;;  %v3644_v14 = vld [vmem:[%s364_s26] sm:$0xff]  ;;  %v2935_v40 = vld [vmem:[%s4861_s3 + $0x30] sm:$0xf] }
  0x2a   : > { %541 = vmatpush.bf16.msra.mxu0 %v3650_v2  ;;  %v3653_v13 = vld [vmem:[%s364_s26 + $0x48] sm:$0xff]  ;;  %v3652_v15 = vld [vmem:[%s364_s26 + $0x40] sm:$0xff]  ;;  %v3673_v41 = vld [vmem:[%s4861_s3 + $0x38] sm:$0xf0]  ;;  %s3846_s26 = sshll.u32 %s4400_s13, 7  ;;  %s2723_s13 = sshll.u32 %s4712_s21, 4  ;;  %s2724_s13 = int_to_ptr.vmem [resolvable:$true] %s2723_s13 }
  0x2b   : > { %565 = vmatpush.bf16.msra.mxu1 %v3658_v3  ;;  %v3664_v36 = vld [vmem:[%s4859_s1 + $0x24] sm:$0xf]  ;;  %v2841_v37 = vld [vmem:[%s4859_s1 + $0x28] sm:$0xf0]  ;;  %v3672_v42 = vld [vmem:[%s4861_s3 + $0x34] sm:$0xf]  ;;  %v2936_v43 = vor.u32 %v3673_v41, %v2935_v40  ;;  %s2722_s29 = scalar_lea.hbm %s4867_s9, %s3846_s26 }
  0x2c   : > { %v2844_v39 = vor.u32 %v3664_v36, %v2841_v37  ;;  %v2937_v44 = vld [vmem:[%s4861_s3 + $0x3c] sm:$0xf0]  ;;  %v2923_v46 = vld [vmem:[%s4861_s3 + $0x18] sm:$0xf]  ;;  %v3670_v47 = vld [vmem:[%s4861_s3 + $0x20] sm:$0xf0] }
  0x2d   : > { %v2940_v45 = vor.u32 %v3672_v42, %v2937_v44  ;;  %v3669_v48 = vld [vmem:[%s4861_s3 + $0x1c] sm:$0xf]  ;;  %686 = vmatpush.bf16.msra.mxu2 %v2936_v43  ;;  %v2924_v49 = vor.u32 %v3670_v47, %v2923_v46  ;;  %v2925_v50 = vld [vmem:[%s4861_s3 + $0x24] sm:$0xf0]  ;;  %v2911_v52 = vld [vmem:[%s4861_s3] sm:$0xf] }
  0x2e   : > { %542 = vmatpush.bf16.msra.mxu0 %v3649_v4  ;;  %v2928_v51 = vor.u32 %v3669_v48, %v2925_v50  ;;  %v3667_v53 = vld [vmem:[%s4861_s3 + $0x8] sm:$0xf0]  ;;  %v3666_v54 = vld [vmem:[%s4861_s3 + $0x4] sm:$0xf]  ;;  %v2913_v56 = vld [vmem:[%s4861_s3 + $0xc] sm:$0xf0] }
  0x2f   : > { %566 = vmatpush.bf16.msra.mxu1 %v3657_v5  ;;  %706 = vmatpush.bf16.msra.mxu3 %v2940_v45  ;;  %v2912_v55 = vor.u32 %v3667_v53, %v2911_v52  ;;  %v2916_v57 = vor.u32 %v3666_v54, %v2913_v56  ;;  %v2955_v58 = vld [vmem:[%s4861_s3 + $0x50] sm:$0xf]  ;;  %v3677_v59 = vld [vmem:[%s4861_s3 + $0x58] sm:$0xf0]  ;;  %v2943_v63 = vld [vmem:[%s4861_s3 + $0x38] sm:$0xf] }
  0x30   : > { %v2956_v60 = vor.u32 %v3677_v59, %v2955_v58  ;;  %v3674_v0 = vld [vmem:[%s4861_s3 + $0x40] sm:$0xf0]  ;;  %v3220_v27 = vld [vmem:[#allocation6 + $0x1f8] sm:$0xf]  ;;  %v3745_v28 = vld [vmem:[#allocation6 + $0x218] sm:$0xf0] }
  0x31   : > { %687 = vmatpush.bf16.msra.mxu2 %v2924_v49  ;;  %v2944_v1 = vor.u32 %v3674_v0, %v2943_v63  ;;  %v3741_v29 = vld [vmem:[#allocation6 + $0x1fc] sm:$0xf]  ;;  %v3221_v30 = vor.u32 %v3745_v28, %v3220_v27  ;;  %v3222_v31 = vld [vmem:[#allocation6 + $0x21c] sm:$0xf0]  ;;  %v3742_v36 = vld [vmem:[#allocation6 + $0x204] sm:$0xf] }
  0x32   : > { %543 = vmatpush.bf16.msra.mxu0 %v3648_v6  ;;  %v3225_v34 = vor.u32 %v3741_v29, %v3222_v31  ;;  %v3230_v37 = vld [vmem:[#allocation6 + $0x224] sm:$0xf0]  ;;  %v3736_v40 = vld [vmem:[#allocation6 + $0x1d0] sm:$0xf0]  ;;  %v3186_v42 = vld [vmem:[#allocation6 + $0x1d4] sm:$0xf0] }
  0x33   : > { %567 = vmatpush.bf16.msra.mxu1 %v3656_v7  ;;  %707 = vmatpush.bf16.msra.mxu3 %v2928_v51  ;;  %v2931_v7 = vld [vmem:[%s4861_s3 + $0x20] sm:$0xf]  ;;  %v3732_v41 = vld [vmem:[#allocation6 + $0x1b4] sm:$0xf]  ;;  %v3192_v45 = vld [vmem:[#allocation6 + $0x1b8] sm:$0xf] }
  0x34   : > { %v3189_v44 = vor.u32 %v3732_v41, %v3186_v42  ;;  %v3737_v46 = vld [vmem:[#allocation6 + $0x1d8] sm:$0xf0]  ;;  %v3194_v49 = vld [vmem:[#allocation6 + $0x1dc] sm:$0xf0]  ;;  %v3148_v50 = vld [vmem:[#allocation6 + $0x168] sm:$0xf] }
  0x35   : > { %688 = vmatpush.bf16.msra.mxu2 %v2912_v55  ;;  %v3733_v47 = vld [vmem:[#allocation6 + $0x1bc] sm:$0xf]  ;;  %v3193_v48 = vor.u32 %v3737_v46, %v3192_v45  ;;  %v3727_v51 = vld [vmem:[#allocation6 + $0x188] sm:$0xf0]  ;;  %v3150_v54 = vld [vmem:[#allocation6 + $0x18c] sm:$0xf0] }
  0x36   : > { %544 = vmatpush.bf16.msra.mxu0 %v3647_v8  ;;  %v3671_v8 = vld [vmem:[%s4861_s3 + $0x28] sm:$0xf0]  ;;  %v3197_v52 = vor.u32 %v3733_v47, %v3194_v49  ;;  %v3156_v55 = vld [vmem:[#allocation6 + $0x170] sm:$0xf]  ;;  %v3149_v56 = vor.u32 %v3727_v51, %v3148_v50  ;;  %v3724_v58 = vld [vmem:[#allocation6 + $0x174] sm:$0xf] }
  0x37   : > { %568 = vmatpush.bf16.msra.mxu1 %v3655_v9  ;;  %708 = vmatpush.bf16.msra.mxu3 %v2916_v57  ;;  %v2919_v9 = vld [vmem:[%s4861_s3 + $0x8] sm:$0xf]  ;;  %v3723_v53 = vld [vmem:[#allocation6 + $0x16c] sm:$0xf]  ;;  %v3728_v57 = vld [vmem:[#allocation6 + $0x190] sm:$0xf0] }
  0x38   : > { %v3158_v59 = vld [vmem:[#allocation6 + $0x194] sm:$0xf0]  ;;  %v3718_v63 = vld [vmem:[#allocation6 + $0x140] sm:$0xf0]  ;;  %v3701_v29 = vld [vmem:[#allocation6 + $0xb8] sm:$0xf0] }
  0x39   : > { %725 = vmatpush.bf16.msrb.mxu2 %v2956_v60  ;;  %v3153_v60 = vor.u32 %v3723_v53, %v3150_v54  ;;  %v3161_v0 = vor.u32 %v3724_v58, %v3158_v59  ;;  %v3048_v28 = vld [vmem:[#allocation6 + $0x98] sm:$0xf]  ;;  %v3692_v42 = vld [vmem:[#allocation6 + $0x70] sm:$0xf0]  ;;  %v2968_v47 = vld [vmem:[#allocation6] sm:$0xf] }
  0x3a   : > { %545 = vmatpush.bf16.msra.mxu0 %v3646_v10  ;;  %v2932_v10 = vor.u32 %v3671_v8, %v2931_v7  ;;  %v3049_v31 = vor.u32 %v3701_v29, %v3048_v28  ;;  %v3014_v45 = vld [vmem:[#allocation6 + $0x74] sm:$0xf0]  ;;  %v3678_v49 = vld [vmem:[#allocation6 + $0x4] sm:$0xf]  ;;  %v2970_v51 = vld [vmem:[#allocation6 + $0x24] sm:$0xf0] }
  0x3b   : > { %569 = vmatpush.bf16.msra.mxu1 %v3654_v11  ;;  %v3668_v11 = vld [vmem:[%s4861_s3 + $0x10] sm:$0xf0]  ;;  %1222 = vmatpush.bf16.msrb.mxu3 %v3221_v30  ;;  %v3683_v53 = vld [vmem:[#allocation6 + $0x28] sm:$0xf0]  ;;  %v2973_v54 = vor.u32 %v3678_v49, %v2970_v51  ;;  %v3236_v29 = vld [vmem:[#allocation6 + $0x208] sm:$0xf] }
  0x3c   : > { %v3739_v51 = vld [vmem:[#allocation6 + $0x1e8] sm:$0xf0]  ;;  %s2725_s14 = sshll.u32 %s2722_s29, 4  ;;  %s2726_s14 = int_to_ptr.hbm [resolvable:$true] %s2725_s14 }
  0x3d   : > { %726 = vmatpush.bf16.msrb.mxu2 %v2944_v1  ;;  %v3714_v1 = vld [vmem:[#allocation6 + $0x124] sm:$0xf]  ;;  %s4262_s17 = sshra.s32 %s2726_s14, 4  ;;  %s4263_s17 = int_to_ptr.hbm [resolvable:$true] %s4262_s17 }
  0x3e   : > { %546 = vmatpush.bf16.msra.mxu0 %v3645_v12  ;;  %s4264_s22 = scalar_lea.hbm %s4263_s17, 128  ;;  %p4269_p3 = scmp.lt.s32.totalorder %s4263_s17, %s4867_s9 }
  0x3f   : > { %570 = vmatpush.bf16.msra.mxu1 %v3653_v13  ;;  %p4265_p0 = scmp.ne.s32.totalorder %s4263_s17, %s4264_s22  ;;  %p4270_p4 = scmp.lt.s32.totalorder %s4268_s25, %s4264_s22 }
  0x41   : > { %727 = vmatpush.bf16.msrb.mxu2 %v2932_v10  ;;  %p4266_p1 = pnand %p4265_p0, %p4417_p5  ;;  %p4271_p7 = por %p4270_p4, %p4269_p3 }
  0x42   : > { %547 = vmatpush.bf16.msra.mxu0 %v3644_v14  ;;  %v2920_v14 = vor.u32 %v3668_v11, %v2919_v9  ;;  %v3076_v11 = vld [vmem:[#allocation6 + $0xd8] sm:$0xf] }
  0x43   : > { %571 = vmatpush.bf16.msra.mxu1 %v3652_v15  ;;  %p4267_p2 = pneg %p4266_p1 }
  0x45   : > { %548 = vmatmul.bf16.vlgmr.msra.gmra.mxu0 %v2824_v20  ;;  %728 = vmatpush.bf16.msrb.mxu2 %v2920_v14  ;;  %p4272_p8 = pnand %p4271_p7, %p4267_p2 }
  0x46   : > { %572 = vmatmul.bf16.vlgmr.msra.gmra.mxu1 %v2828_v21  ;;  %1246 = vmatpush.bf16.msrb.mxu0 %v3225_v34 }
  0x4a   : > { %1247 = vmatpush.bf16.msrb.mxu0 %v3189_v44 }
  0x4e   : > { %1248 = vmatpush.bf16.msrb.mxu0 %v3153_v60 }
  0x55   : > { %553 = vmatmul.bf16.gmra.mxu0 %v2832_v32  ;;  %v3228_v32 = vld [vmem:[#allocation6 + $0x200] sm:$0xf] }
  0x56   : > { %577 = vmatmul.bf16.gmra.mxu1 %v2836_v33  ;;  %v3746_v33 = vld [vmem:[#allocation6 + $0x220] sm:$0xf0] }
  0x57   : > { %v3229_v35 = vor.u32 %v3746_v33, %v3228_v32  ;;  %v3697_v32 = vld [vmem:[#allocation6 + $0x9c] sm:$0xf]  ;;  %v3050_v33 = vld [vmem:[#allocation6 + $0xbc] sm:$0xf0] }
  0x58   : > { %v3053_v34 = vor.u32 %v3697_v32, %v3050_v33  ;;  %v3743_v33 = vld [vmem:[#allocation6 + $0x20c] sm:$0xf] }
  0x59   : > { %1270 = vmatpush.bf16.msrb.mxu1 %v3229_v35  ;;  %v3004_v35 = vld [vmem:[#allocation6 + $0x48] sm:$0xf] }
  0x5d   : > { %1271 = vmatpush.bf16.msrb.mxu1 %v3193_v48  ;;  %v3682_v48 = vld [vmem:[#allocation6 + $0x20] sm:$0xf0] }
  0x5e   : > { %v2969_v50 = vor.u32 %v3682_v48, %v2968_v47  ;;  %v3729_v47 = vld [vmem:[#allocation6 + $0x198] sm:$0xf0]  ;;  %v3202_v48 = vld [vmem:[#allocation6 + $0x1e4] sm:$0xf0] }
  0x65   : > { %558 = vmatmul.bf16.gmra.mxu0 %v2840_v38  ;;  %v3184_v38 = vld [vmem:[#allocation6 + $0x1b0] sm:$0xf] }
  0x66   : > { %582 = vmatmul.bf16.gmra.mxu1 %v2844_v39  ;;  %v3233_v39 = vor.u32 %v3742_v36, %v3230_v37  ;;  %v3185_v43 = vor.u32 %v3736_v40, %v3184_v38  ;;  %v3691_v36 = vld [vmem:[#allocation6 + $0x68] sm:$0xf0]  ;;  %v3012_v40 = vld [vmem:[#allocation6 + $0x50] sm:$0xf] }
  0x67   : > { %v3687_v37 = vld [vmem:[#allocation6 + $0x4c] sm:$0xf]  ;;  %v3005_v38 = vor.u32 %v3691_v36, %v3004_v35  ;;  %v3013_v44 = vor.u32 %v3692_v42, %v3012_v40  ;;  %v3244_v36 = vld [vmem:[#allocation6 + $0x210] sm:$0xf]  ;;  %v3246_v40 = vld [vmem:[#allocation6 + $0x234] sm:$0xf0] }
  0x68   : > { %1223 = vmatpush.bf16.msrb.mxu3 %v3185_v43  ;;  %v3688_v43 = vld [vmem:[#allocation6 + $0x54] sm:$0xf]  ;;  %v3200_v42 = vld [vmem:[#allocation6 + $0x1c0] sm:$0xf] }
  0x69   : > { %v3017_v46 = vor.u32 %v3688_v43, %v3014_v45  ;;  %v3738_v43 = vld [vmem:[#allocation6 + $0x1e0] sm:$0xf0] }
  0x6a   : > { %v3201_v45 = vor.u32 %v3738_v43, %v3200_v42  ;;  %v3693_v42 = vld [vmem:[#allocation6 + $0x78] sm:$0xf0] }
  0x6c   : > { %1224 = vmatpush.bf16.msrb.mxu3 %v3149_v56  ;;  %v3679_v56 = vld [vmem:[#allocation6 + $0xc] sm:$0xf] }
  0xc2   : > { %v549_v61 = vpop.f32.mrf.mxu0 }
  0xc3   : > { %v573_v62 = vpop.f32.mrf.mxu1 }
  0xc4   : > { %v574_v4 = vadd.f32 %v573_v62, %v549_v61  ;;  %v3157_v61 = vor.u32 %v3728_v57, %v3156_v55  ;;  %v3112_v62 = vld [vmem:[#allocation6 + $0x120] sm:$0xf]  ;;  %v2978_v57 = vld [vmem:[#allocation6 + $0x2c] sm:$0xf0] }
  0xc5   : > { %v3113_v7 = vor.u32 %v3718_v63, %v3112_v62  ;;  %v2981_v58 = vor.u32 %v3679_v56, %v2978_v57  ;;  %v753_v63 = vld [vmem:[%s4863_s5] sm:$0xff] }
  0xc6   : > { %1272 = vmatpush.bf16.msrb.mxu1 %v3157_v61  ;;  %v741_v61 = vld [vmem:[%s4862_s4] sm:$0xff] }
  0xc7   : > { %1225 = vmatpush.bf16.msrb.mxu3 %v3113_v7 }
  0xca   : > { %v551_v2 = vpop.f32.mrf.mxu0 }
  0xcb   : > { %v575_v3 = vpop.f32.mrf.mxu1 }
  0xcc   : > { %v576_v5 = vadd.f32 %v575_v3, %v551_v2  ;;  %v3114_v2 = vld [vmem:[#allocation6 + $0x144] sm:$0xf0] }
  0xcd   : > { %v3120_v3 = vld [vmem:[#allocation6 + $0x128] sm:$0xf]  ;;  %v3117_v8 = vor.u32 %v3714_v1, %v3114_v2 }
  0xce   : > { %v588_v6 = vpack.c.bf16 %v576_v5, %v574_v4  ;;  %v3719_v4 = vld [vmem:[#allocation6 + $0x148] sm:$0xf0] }
  0xcf   : > { %v3715_v5 = vld [vmem:[#allocation6 + $0x12c] sm:$0xf]  ;;  %v3121_v9 = vor.u32 %v3719_v4, %v3120_v3  ;;  %1249 = vmatpush.bf16.msrb.mxu0 %v3117_v8 }
  0xd0   : > { %2957 = vmatmul.msk.bf16.vlgmr.msra.gmra.mxu2 %vm671_vm0, %v588_v6  ;;  %2960 = vmatmul.msk.bf16.vlgmr.msra.gmra.mxu3 %vm671_vm0, %v588_v6  ;;  %v754_v2 = vld [vmem:[%s4863_s5 + $0x8] sm:$0xff] }
  0xd1   : > { %1294 = vmatpush.bf16.msra.mxu2 %v3233_v39  ;;  %1273 = vmatpush.bf16.msrb.mxu1 %v3121_v9  ;;  %v3006_v39 = vld [vmem:[#allocation6 + $0x6c] sm:$0xf0] }
  0xd2   : > { %v554_v12 = vpop.f32.mrf.mxu0  ;;  %v3009_v41 = vor.u32 %v3687_v37, %v3006_v39  ;;  %v3748_v37 = vld [vmem:[#allocation6 + $0x230] sm:$0xf0] }
  0xd3   : > { %v578_v13 = vpop.f32.mrf.mxu1  ;;  %v3744_v39 = vld [vmem:[#allocation6 + $0x214] sm:$0xf] }
  0xd4   : > { %v579_v17 = vadd.f32 %v578_v13, %v554_v12  ;;  %v3709_v12 = vld [vmem:[#allocation6 + $0xf8] sm:$0xf0] }
  0xd5   : > { %1295 = vmatpush.bf16.msra.mxu2 %v3197_v52  ;;  %v3705_v13 = vld [vmem:[#allocation6 + $0xdc] sm:$0xf]  ;;  %v3077_v14 = vor.u32 %v3709_v12, %v3076_v11  ;;  %v2976_v52 = vld [vmem:[#allocation6 + $0x8] sm:$0xf]  ;;  %v743_v12 = vld [vmem:[%s4862_s4 + $0x10] sm:$0xff] }
  0xd6   : > { %v2977_v55 = vor.u32 %v3683_v53, %v2976_v52  ;;  %v3735_v52 = vld [vmem:[#allocation6 + $0x1cc] sm:$0xf] }
  0xd7   : > { %1226 = vmatpush.bf16.msrb.mxu3 %v3077_v14  ;;  %v755_v14 = vld [vmem:[%s4863_s5 + $0x10] sm:$0xff] }
  0xd9   : > { %1296 = vmatpush.bf16.msra.mxu2 %v3161_v0  ;;  %v742_v0 = vld [vmem:[%s4862_s4 + $0x8] sm:$0xff] }
  0xda   : > { %v556_v15 = vpop.f32.mrf.mxu0 }
  0xdb   : > { %v580_v16 = vpop.f32.mrf.mxu1 }
  0xdc   : > { %v581_v18 = vadd.f32 %v580_v16, %v556_v15  ;;  %v3078_v15 = vld [vmem:[#allocation6 + $0xfc] sm:$0xf0] }
  0xdd   : > { %v3084_v16 = vld [vmem:[#allocation6 + $0xe0] sm:$0xf] }
  0xde   : > { %v4567_v19 = vpack.c.bf16 %v581_v18, %v579_v17  ;;  %v3081_v17 = vor.u32 %v3705_v13, %v3078_v15  ;;  %v3710_v18 = vld [vmem:[#allocation6 + $0x100] sm:$0xf0]  ;;  %v744_v15 = vld [vmem:[%s4862_s4 + $0x18] sm:$0xff] }
  0xe0   : > { %2958 = vmatmul.msk.bf16.gmra.mxu2 %vm671_vm0, %v4567_v19  ;;  %2961 = vmatmul.msk.bf16.gmra.mxu3 %vm671_vm0, %v4567_v19 }
  0xe1   : > { %1250 = vmatpush.bf16.msrb.mxu0 %v3081_v17 }
  0xe2   : > { %v559_v20 = vpop.f32.mrf.mxu0 }
  0xe3   : > { %v583_v21 = vpop.f32.mrf.mxu1 }
  0xe4   : > { %v584_v24 = vadd.f32 %v583_v21, %v559_v20  ;;  %v3706_v20 = vld [vmem:[#allocation6 + $0xe4] sm:$0xf]  ;;  %v3085_v21 = vor.u32 %v3710_v18, %v3084_v16  ;;  %v756_v18 = vld [vmem:[%s4863_s5 + $0x18] sm:$0xff] }
  0xe6   : > { %1274 = vmatpush.bf16.msrb.mxu1 %v3085_v21 }
  0xea   : > { %v561_v22 = vpop.f32.mrf.mxu0  ;;  %1275 = vmatpush.bf16.msrb.mxu1 %v3049_v31 }
  0xeb   : > { %v585_v23 = vpop.f32.mrf.mxu1 }
  0xec   : > { %v586_v25 = vadd.f32 %v585_v23, %v561_v22  ;;  %v3086_v22 = vld [vmem:[#allocation6 + $0x104] sm:$0xf0]  ;;  %v3040_v23 = vld [vmem:[#allocation6 + $0x90] sm:$0xf] }
  0xee   : > { %v4573_v26 = vpack.c.bf16 %v586_v25, %v584_v24  ;;  %v3700_v24 = vld [vmem:[#allocation6 + $0xb0] sm:$0xf0]  ;;  %1276 = vmatpush.bf16.msrb.mxu1 %v3013_v44  ;;  %v3734_v44 = vld [vmem:[#allocation6 + $0x1c4] sm:$0xf] }
  0xef   : > { %v3696_v25 = vld [vmem:[#allocation6 + $0x94] sm:$0xf]  ;;  %v3041_v27 = vor.u32 %v3700_v24, %v3040_v23  ;;  %v3205_v49 = vor.u32 %v3734_v44, %v3202_v48  ;;  %v3689_v44 = vld [vmem:[#allocation6 + $0x5c] sm:$0xf]  ;;  %v3694_v48 = vld [vmem:[#allocation6 + $0x80] sm:$0xf0] }
  0xf0   : > { %2959 = vmatmul.msk.bf16.gmra.mxu2 %vm671_vm0, %v4573_v26  ;;  %2962 = vmatmul.msk.bf16.gmra.mxu3 %vm671_vm0, %v4573_v26 }
  0xf1   : > { %1227 = vmatpush.bf16.msrb.mxu3 %v3041_v27 }
  0xf2   : > { %1277 = vmatpush.bf16.msrb.mxu1 %v2977_v55  ;;  %v3210_v55 = vld [vmem:[#allocation6 + $0x1ec] sm:$0xf0] }
  0xf3   : > { %v3213_v57 = vor.u32 %v3735_v52, %v3210_v55 }
  0xf5   : > { %1228 = vmatpush.bf16.msrb.mxu3 %v3005_v38  ;;  %v3245_v38 = vor.u32 %v3748_v37, %v3244_v36  ;;  %v3064_v36 = vld [vmem:[#allocation6 + $0xa8] sm:$0xf]  ;;  %v3703_v37 = vld [vmem:[#allocation6 + $0xc8] sm:$0xf0] }
  0xf7   : > { %1366 = vmatpush.bf16.msra.mxu1 %v3245_v38  ;;  %v3699_v38 = vld [vmem:[#allocation6 + $0xac] sm:$0xf] }
  0xf9   : > { %1229 = vmatpush.bf16.msrb.mxu3 %v2969_v50  ;;  %v3208_v50 = vld [vmem:[#allocation6 + $0x1c8] sm:$0xf] }
 0x100   : > { %2963 = vmatmul.msk.bf16.vlgmr.msrb.gmra.mxu2 %vm671_vm0, %v588_v6  ;;  %v3122_v6 = vld [vmem:[#allocation6 + $0x14c] sm:$0xf0] }
 0x101   : > { %v3125_v10 = vor.u32 %v3715_v5, %v3122_v6 }
 0x103   : > { %1297 = vmatpush.bf16.msra.mxu2 %v3125_v10 }
 0x110   : > { %2964 = vmatmul.msk.bf16.gmra.mxu2 %vm671_vm0, %v4567_v19  ;;  %v3089_v19 = vor.u32 %v3706_v20, %v3086_v22 }
 0x112   : > { %1298 = vmatpush.bf16.msra.mxu2 %v3089_v19 }
 0x116   : > { %1299 = vmatpush.bf16.msra.mxu2 %v3053_v34  ;;  %v3238_v34 = vld [vmem:[#allocation6 + $0x22c] sm:$0xf0] }
 0x117   : > { %v3241_v35 = vor.u32 %v3743_v33, %v3238_v34  ;;  %v3058_v33 = vld [vmem:[#allocation6 + $0xc4] sm:$0xf0] }
 0x11a   : > { %1300 = vmatpush.bf16.msra.mxu2 %v3017_v46  ;;  %v3164_v46 = vld [vmem:[#allocation6 + $0x178] sm:$0xf] }
 0x11b   : > { %v3165_v53 = vor.u32 %v3729_v47, %v3164_v46  ;;  %v3028_v46 = vld [vmem:[#allocation6 + $0x60] sm:$0xf] }
 0x11c   : > { %v3029_v55 = vor.u32 %v3694_v48, %v3028_v46 }
 0x11e   : > { %1301 = vmatpush.bf16.msra.mxu2 %v2981_v58  ;;  %v3725_v58 = vld [vmem:[#allocation6 + $0x17c] sm:$0xf] }
 0x120   : > { %2965 = vmatmul.msk.bf16.gmra.mxu2 %vm671_vm0, %v4573_v26  ;;  %v3042_v26 = vld [vmem:[#allocation6 + $0xb4] sm:$0xf0] }
 0x121   : > { %v3045_v30 = vor.u32 %v3696_v25, %v3042_v26 }
 0x123   : > { %1251 = vmatpush.bf16.msrb.mxu0 %v3045_v30  ;;  %v3747_v30 = vld [vmem:[#allocation6 + $0x228] sm:$0xf0] }
 0x124   : > { %v3237_v31 = vor.u32 %v3747_v30, %v3236_v29  ;;  %v3056_v29 = vld [vmem:[#allocation6 + $0xa0] sm:$0xf] }
 0x126   : > { %1318 = vmatpush.bf16.msra.mxu3 %v3237_v31  ;;  %v3702_v31 = vld [vmem:[#allocation6 + $0xc0] sm:$0xf0] }
 0x127   : > { %1252 = vmatpush.bf16.msrb.mxu0 %v3009_v41  ;;  %v3249_v41 = vor.u32 %v3744_v39, %v3246_v40  ;;  %v3057_v34 = vor.u32 %v3702_v31, %v3056_v29  ;;  %v3065_v39 = vor.u32 %v3703_v37, %v3064_v36  ;;  %v3066_v40 = vld [vmem:[#allocation6 + $0xcc] sm:$0xf0]  ;;  %v3713_v31 = vld [vmem:[#allocation6 + $0x118] sm:$0xf0]  ;;  %v3036_v36 = vld [vmem:[#allocation6 + $0x68] sm:$0xf] }
 0x128   : > { %v3069_v43 = vor.u32 %v3699_v38, %v3066_v40  ;;  %v3695_v37 = vld [vmem:[#allocation6 + $0x88] sm:$0xf0]  ;;  %v3686_v40 = vld [vmem:[#allocation6 + $0x40] sm:$0xf0] }
 0x129   : > { %1390 = vmatpush.bf16.msrb.mxu2 %v3249_v41  ;;  %v3020_v41 = vld [vmem:[#allocation6 + $0x58] sm:$0xf]  ;;  %v3037_v38 = vor.u32 %v3695_v37, %v3036_v36  ;;  %v3256_v36 = vld [vmem:[#allocation3] sm:$0xf]  ;;  %v3752_v37 = vld [vmem:[#allocation3 + $0xc] sm:$0xf0] }
 0x12a   : > { %1319 = vmatpush.bf16.msra.mxu3 %v3201_v45  ;;  %v3022_v45 = vld [vmem:[#allocation6 + $0x7c] sm:$0xf0]  ;;  %v3021_v47 = vor.u32 %v3693_v42, %v3020_v41 }
 0x12b   : > { %1253 = vmatpush.bf16.msrb.mxu0 %v2973_v54  ;;  %v3209_v54 = vor.u32 %v3739_v51, %v3208_v50  ;;  %v3030_v50 = vld [vmem:[#allocation6 + $0x84] sm:$0xf0]  ;;  %v3025_v52 = vor.u32 %v3689_v44, %v3022_v45 }
 0x12d   : > { %1367 = vmatpush.bf16.msra.mxu1 %v3209_v54  ;;  %1391 = vmatpush.bf16.msrb.mxu2 %v3213_v57  ;;  %v3684_v54 = vld [vmem:[#allocation6 + $0x30] sm:$0xf0]  ;;  %v2986_v57 = vld [vmem:[#allocation6 + $0x34] sm:$0xf0] }
 0x12e   : > { %1320 = vmatpush.bf16.msra.mxu3 %v3165_v53  ;;  %v2984_v53 = vld [vmem:[#allocation6 + $0x10] sm:$0xf] }
 0x12f   : > { %1342 = vmatpush.bf16.msra.mxu0 %v3241_v35 }
 0x133   : > { %1343 = vmatpush.bf16.msra.mxu0 %v3205_v49  ;;  %v3690_v49 = vld [vmem:[#allocation6 + $0x64] sm:$0xf] }
 0x153   : > { %v690_v59 = vpop.f32.mrf.mxu2  ;;  %v710_v60 = vpop.f32.mrf.mxu3 }
 0x154   : > { %v747_v62 = vmul.f32 %v741_v61, %v690_v59  ;;  %v3166_v59 = vld [vmem:[#allocation6 + $0x19c] sm:$0xf0] }
 0x155   : > { %v3169_v60 = vor.u32 %v3725_v58, %v3166_v59  ;;  %v3172_v61 = vld [vmem:[#allocation6 + $0x180] sm:$0xf]  ;;  %v3033_v58 = vor.u32 %v3690_v49, %v3030_v50  ;;  %v2992_v59 = vld [vmem:[#allocation6 + $0x18] sm:$0xf] }
 0x156   : > { %v759_v4 = vadd.f32 %v753_v63, %v747_v62  ;;  %v3730_v62 = vld [vmem:[#allocation6 + $0x1a0] sm:$0xf0] }
 0x157   : > { %v3173_v63 = vor.u32 %v3730_v62, %v3172_v61  ;;  %1344 = vmatpush.bf16.msra.mxu0 %v3169_v60  ;;  %v3685_v60 = vld [vmem:[#allocation6 + $0x38] sm:$0xf0]  ;;  %v2985_v61 = vor.u32 %v3684_v54, %v2984_v53 }
 0x158   : > { %v765_v7 = vmax.f32 %v759_v4, 0.0  ;;  %v3720_v4 = vld [vmem:[#allocation6 + $0x150] sm:$0xf0]  ;;  %v3681_v62 = vld [vmem:[#allocation6 + $0x1c] sm:$0xf] }
 0x159   : > { %1368 = vmatpush.bf16.msra.mxu1 %v3173_v63  ;;  %v2994_v63 = vld [vmem:[#allocation6 + $0x3c] sm:$0xf0] }
 0x15b   : > { %v692_v1 = vpop.f32.mrf.mxu2  ;;  %v711_v3 = vpop.f32.mrf.mxu3 }
 0x15c   : > { %v748_v5 = vmul.f32 %v742_v0, %v692_v1  ;;  %v3726_v0 = vld [vmem:[#allocation6 + $0x184] sm:$0xf]  ;;  %v3174_v1 = vld [vmem:[#allocation6 + $0x1a4] sm:$0xf0]  ;;  %v3128_v3 = vld [vmem:[#allocation6 + $0x130] sm:$0xf] }
 0x15e   : > { %v760_v6 = vadd.f32 %v754_v2, %v748_v5  ;;  %v3177_v2 = vor.u32 %v3726_v0, %v3174_v1  ;;  %v3716_v5 = vld [vmem:[#allocation6 + $0x134] sm:$0xf]  ;;  %v2993_v1 = vor.u32 %v3685_v60, %v2992_v59 }
 0x160   : > { %v766_v8 = vmax.f32 %v760_v6, 0.0  ;;  %v3129_v6 = vor.u32 %v3720_v4, %v3128_v3  ;;  %1392 = vmatpush.bf16.msrb.mxu2 %v3177_v2  ;;  %v2997_v2 = vor.u32 %v3681_v62, %v2994_v63  ;;  %v745_v4 = vld [vmem:[%s4862_s4 + $0x20] sm:$0xff] }
 0x162   : > { %v4596_v9 = vpack.c.bf16 %v766_v8, %v765_v7  ;;  %v3130_v7 = vld [vmem:[#allocation6 + $0x154] sm:$0xf0]  ;;  %1321 = vmatpush.bf16.msra.mxu3 %v3129_v6  ;;  %v3749_v6 = vld [vmem:[#allocation6 + $0x238] sm:$0xf0] }
 0x163   : > { %v695_v10 = vpop.f32.mrf.mxu2  ;;  %v713_v11 = vpop.f32.mrf.mxu3  ;;  %v3136_v8 = vld [vmem:[#allocation6 + $0x138] sm:$0xf] }
 0x164   : > { %1230 = vmatmul.bf16.vlgmr.msrb.gmra.mxu3 %v4596_v9  ;;  %1254 = vmatmul.bf16.vlgmr.msrb.gmra.mxu0 %v4596_v9  ;;  %v749_v13 = vmul.f32 %v743_v12, %v713_v11  ;;  %v3721_v10 = vld [vmem:[#allocation6 + $0x158] sm:$0xf0]  ;;  %v3133_v11 = vor.u32 %v3716_v5, %v3130_v7  ;;  %v3252_v5 = vld [vmem:[#allocation6 + $0x218] sm:$0xf]  ;;  %v3216_v7 = vld [vmem:[#allocation6 + $0x1d0] sm:$0xf] }
 0x165   : > { %1278 = vmatmul.bf16.vlgmr.msrb.gmra.mxu1 %v4596_v9  ;;  %1302 = vmatmul.bf16.vlgmr.msra.gmra.mxu2 %v4596_v9  ;;  %v3137_v12 = vor.u32 %v3721_v10, %v3136_v8  ;;  %v3253_v8 = vor.u32 %v3749_v6, %v3252_v5  ;;  %v3740_v10 = vld [vmem:[#allocation6 + $0x1f0] sm:$0xf0] }
 0x166   : > { %v761_v20 = vadd.f32 %v755_v14, %v749_v13  ;;  %v3717_v13 = vld [vmem:[#allocation6 + $0x13c] sm:$0xf]  ;;  %v3138_v14 = vld [vmem:[#allocation6 + $0x15c] sm:$0xf0]  ;;  %1345 = vmatpush.bf16.msra.mxu0 %v3133_v11 }
 0x167   : > { %1369 = vmatpush.bf16.msra.mxu1 %v3137_v12  ;;  %v3217_v12 = vor.u32 %v3740_v10, %v3216_v7 }
 0x168   : > { %v767_v19 = vmax.f32 %v761_v20, 0.0  ;;  %v3707_v20 = vld [vmem:[#allocation6 + $0xec] sm:$0xf] }
 0x16b   : > { %v696_v16 = vpop.f32.mrf.mxu2  ;;  %v715_v17 = vpop.f32.mrf.mxu3 }
 0x16c   : > { %v750_v21 = vmul.f32 %v744_v15, %v715_v17  ;;  %v3141_v15 = vor.u32 %v3717_v13, %v3138_v14  ;;  %v3092_v17 = vld [vmem:[#allocation6 + $0xe8] sm:$0xf]  ;;  %v757_v13 = vld [vmem:[%s4863_s5 + $0x20] sm:$0xff] }
 0x16d   : > { %v746_v14 = vld [vmem:[%s4862_s4 + $0x28] sm:$0xff] }
 0x16e   : > { %v762_v22 = vadd.f32 %v756_v18, %v750_v21  ;;  %v3711_v18 = vld [vmem:[#allocation6 + $0x108] sm:$0xf0]  ;;  %1393 = vmatpush.bf16.msrb.mxu2 %v3141_v15 }
 0x16f   : > { %v3093_v21 = vor.u32 %v3711_v18, %v3092_v17 }
 0x170   : > { %v768_v23 = vmax.f32 %v762_v22, 0.0  ;;  %v3094_v22 = vld [vmem:[#allocation6 + $0x10c] sm:$0xf0] }
 0x171   : > { %1322 = vmatpush.bf16.msra.mxu3 %v3093_v21 }
 0x172   : > { %v4614_v24 = vpack.c.bf16 %v768_v23, %v767_v19  ;;  %v3100_v19 = vld [vmem:[#allocation6 + $0xf0] sm:$0xf]  ;;  %v3712_v23 = vld [vmem:[#allocation6 + $0x110] sm:$0xf0] }
 0x173   : > { %v698_v25 = vpop.f32.mrf.mxu2  ;;  %v718_v27 = vpop.f32.mrf.mxu3 }
 0x174   : > { %1235 = vmatmul.bf16.gmra.mxu3 %v4614_v24  ;;  %1259 = vmatmul.bf16.gmra.mxu0 %v4614_v24  ;;  %v3097_v25 = vor.u32 %v3707_v20, %v3094_v22  ;;  %v3101_v27 = vor.u32 %v3712_v23, %v3100_v19  ;;  %v3180_v23 = vld [vmem:[#allocation6 + $0x188] sm:$0xf] }
 0x175   : > { %1283 = vmatmul.bf16.gmra.mxu1 %v4614_v24  ;;  %1307 = vmatmul.bf16.gmra.mxu2 %v4614_v24 }
 0x176   : > { %1346 = vmatpush.bf16.msra.mxu0 %v3097_v25  ;;  %1370 = vmatpush.bf16.msra.mxu1 %v3101_v27  ;;  %v3731_v25 = vld [vmem:[#allocation6 + $0x1a8] sm:$0xf0]  ;;  %v3144_v27 = vld [vmem:[#allocation6 + $0x140] sm:$0xf] }
 0x177   : > { %1323 = vmatpush.bf16.msra.mxu3 %v3057_v34  ;;  %v3704_v34 = vld [vmem:[#allocation6 + $0xd0] sm:$0xf0] }
 0x17a   : > { %1371 = vmatpush.bf16.msra.mxu1 %v3065_v39  ;;  %v3000_v39 = vld [vmem:[#allocation6 + $0x20] sm:$0xf] }
 0x17b   : > { %v699_v26 = vpop.f32.mrf.mxu2  ;;  %v719_v28 = vpop.f32.mrf.mxu3  ;;  %1324 = vmatpush.bf16.msra.mxu3 %v3021_v47  ;;  %v3001_v41 = vor.u32 %v3686_v40, %v3000_v39 }
 0x17c   : > { %v3708_v26 = vld [vmem:[#allocation6 + $0xf4] sm:$0xf]  ;;  %v3102_v28 = vld [vmem:[#allocation6 + $0x114] sm:$0xf0] }
 0x17d   : > { %v3105_v30 = vor.u32 %v3708_v26, %v3102_v28  ;;  %v3181_v26 = vor.u32 %v3731_v25, %v3180_v23  ;;  %v3722_v28 = vld [vmem:[#allocation6 + $0x160] sm:$0xf0] }
 0x17e   : > { %1372 = vmatpush.bf16.msra.mxu1 %v3029_v55  ;;  %v3145_v29 = vor.u32 %v3722_v28, %v3144_v27 }
 0x17f   : > { %1394 = vmatpush.bf16.msrb.mxu2 %v3105_v30  ;;  %1325 = vmatpush.bf16.msra.mxu3 %v2985_v61  ;;  %v3108_v30 = vld [vmem:[#allocation6 + $0xf8] sm:$0xf] }
 0x182   : > { %1373 = vmatpush.bf16.msra.mxu1 %v2993_v1 }
 0x183   : > { %v730_v32 = vpop.f32.mrf.mxu2  ;;  %1395 = vmatpush.bf16.msrb.mxu2 %v3069_v43  ;;  %1414 = vmatpush.bf16.msrb.mxu3 %v3253_v8 }
 0x184   : > { %v3698_v32 = vld [vmem:[#allocation6 + $0xa4] sm:$0xf] }
 0x185   : > { %v3061_v35 = vor.u32 %v3698_v32, %v3058_v33  ;;  %v3109_v32 = vor.u32 %v3713_v31, %v3108_v30  ;;  %v3072_v33 = vld [vmem:[#allocation6 + $0xb0] sm:$0xf] }
 0x187   : > { %1347 = vmatpush.bf16.msra.mxu0 %v3061_v35  ;;  %1396 = vmatpush.bf16.msrb.mxu2 %v3033_v58  ;;  %v3073_v35 = vor.u32 %v3704_v34, %v3072_v33 }
 0x188   : > { %1415 = vmatpush.bf16.msrb.mxu3 %v3217_v12 }
 0x18b   : > { %v731_v56 = vpop.f32.mrf.mxu2  ;;  %1348 = vmatpush.bf16.msra.mxu0 %v3025_v52  ;;  %1397 = vmatpush.bf16.msrb.mxu2 %v2997_v2 }
 0x18c   : > { %v3680_v56 = vld [vmem:[#allocation6 + $0x14] sm:$0xf]  ;;  %1416 = vmatpush.bf16.msrb.mxu3 %v3181_v26 }
 0x18d   : > { %v2989_v0 = vor.u32 %v3680_v56, %v2986_v57 }
 0x18f   : > { %1349 = vmatpush.bf16.msra.mxu0 %v2989_v0 }
 0x190   : > { %1417 = vmatpush.bf16.msrb.mxu3 %v3145_v29 }
 0x193   : > { %v733_v16 = vpop.f32.mrf.mxu2 }
 0x194   : > { %v758_v16 = vld [vmem:[%s4863_s5 + $0x28] sm:$0xff]  ;;  %1418 = vmatpush.bf16.msrb.mxu3 %v3109_v32 }
 0x198   : > { %1419 = vmatpush.bf16.msrb.mxu3 %v3073_v35 }
 0x19b   : > { %v734_v51 = vpop.f32.mrf.mxu2 }
 0x19c   : > { %1420 = vmatpush.bf16.msrb.mxu3 %v3037_v38 }
 0x1a0   : > { %1421 = vmatpush.bf16.msrb.mxu3 %v3001_v41  ;;  %v3257_v41 = vor.u32 %v3752_v37, %v3256_v36  ;;  %v3280_v36 = vld [vmem:[#allocation3 + $0x28] sm:$0xf]  ;;  %v3757_v37 = vld [vmem:[#allocation3 + $0x34] sm:$0xf0] }
 0x1a3   : > { %v736_v3 = vpop.f32.mrf.mxu2 }
 0x1a4   : > { %v751_v11 = vmul.f32 %v745_v4, %v736_v3 }
 0x1a6   : > { %v763_v17 = vadd.f32 %v757_v13, %v751_v11 }
 0x1a8   : > { %v769_v21 = vmax.f32 %v763_v17, 0.0 }
 0x1ab   : > { %v738_v15 = vpop.f32.mrf.mxu2 }
 0x1ac   : > { %v752_v18 = vmul.f32 %v746_v14, %v738_v15 }
 0x1ae   : > { %v764_v20 = vadd.f32 %v758_v16, %v752_v18 }
 0x1b0   : > { %v770_v22 = vmax.f32 %v764_v20, 0.0 }
 0x1b2   : > { %v4632_v19 = vpack.c.bf16 %v770_v22, %v769_v21 }
 0x1b4   : > { %1240 = vmatmul.bf16.gmra.mxu3 %v4632_v19  ;;  %1264 = vmatmul.bf16.gmra.mxu0 %v4632_v19 }
 0x1b5   : > { %1288 = vmatmul.bf16.gmra.mxu1 %v4632_v19  ;;  %1312 = vmatmul.bf16.gmra.mxu2 %v4632_v19 }
 0x1c4   : > { %1326 = vmatmul.bf16.vlgmr.msra.gmra.mxu3 %v4596_v9  ;;  %1350 = vmatmul.bf16.vlgmr.msra.gmra.mxu0 %v4596_v9 }
 0x1c5   : > { %1374 = vmatmul.bf16.vlgmr.msra.gmra.mxu1 %v4596_v9  ;;  %1398 = vmatmul.bf16.vlgmr.msrb.gmra.mxu2 %v4596_v9 }
 0x1d4   : > { %1331 = vmatmul.bf16.gmra.mxu3 %v4614_v24  ;;  %1355 = vmatmul.bf16.gmra.mxu0 %v4614_v24 }
 0x1d5   : > { %1379 = vmatmul.bf16.gmra.mxu1 %v4614_v24  ;;  %1403 = vmatmul.bf16.gmra.mxu2 %v4614_v24 }
 0x1e1   : > { %v1255_v42 = vpop.f32.mrf.mxu0 }
 0x1e2   : > { %v1279_v43 = vpop.f32.mrf.mxu1 }
 0x1e4   : > { %1336 = vmatmul.bf16.gmra.mxu3 %v4632_v19  ;;  %1360 = vmatmul.bf16.gmra.mxu0 %v4632_v19 }
 0x1e5   : > { %1384 = vmatmul.bf16.gmra.mxu1 %v4632_v19  ;;  %1408 = vmatmul.bf16.gmra.mxu2 %v4632_v19 }
 0x1e7   : > { %v1231_v44 = vpop.f32.mrf.mxu3 }
 0x1e8   : > { %v1303_v45 = vpop.f32.mrf.mxu2 }
 0x1e9   : > { %v1257_v46 = vpop.f32.mrf.mxu0 }
 0x1ea   : > { %v3865_v47 = vpack.c.bf16 %v1257_v46, %v1255_v42  ;;  %v1281_v48 = vpop.f32.mrf.mxu1 }
 0x1eb   : > { %v3880_v49 = vpack.c.bf16 %v1281_v48, %v1279_v43 }
 0x1ec   : > { %4064 = vst [vmem:[#allocation2 + $0x18] sm:$0xff] %v3865_v47  }
 0x1ed   : > { %4067 = vst [vmem:[#allocation2 + $0x30] sm:$0xff] %v3880_v49  }
 0x1ef   : > { %v1233_v50 = vpop.f32.mrf.mxu3 }
 0x1f0   : > { %v3850_v51 = vpack.c.bf16 %v1233_v50, %v1231_v44  ;;  %v1305_v52 = vpop.f32.mrf.mxu2 }
 0x1f1   : > { %v3895_v53 = vpack.c.bf16 %v1305_v52, %v1303_v45  ;;  %v1260_v54 = vpop.f32.mrf.mxu0  ;;  %v3272_v52 = vld [vmem:[#allocation3 + $0x20] sm:$0xf] }
 0x1f2   : > { %3851 = vst [vmem:[#allocation2] sm:$0xff] %v3850_v51   ;;  %v1284_v55 = vpop.f32.mrf.mxu1 }
 0x1f3   : > { %4070 = vst [vmem:[#allocation2 + $0x48] sm:$0xff] %v3895_v53   ;;  %v3817_v27 = vld [vmem:[#allocation2 + $0x18] sm:$0xff]  ;;  %v3756_v53 = vld [vmem:[#allocation3 + $0x2c] sm:$0xf0] }
 0x1f4   : > { %1422 = vmatmul.bf16.vlgmr.msrb.gmra.mxu3 %v4596_v9  ;;  %v3820_v3 = vld [vmem:[#allocation2 + $0x30] sm:$0xff] }
 0x1f7   : > { %v1236_v56 = vpop.f32.mrf.mxu3 }
 0x1f8   : > { %v1308_v57 = vpop.f32.mrf.mxu2 }
 0x1f9   : > { %v1262_v58 = vpop.f32.mrf.mxu0  ;;  %v3814_v39 = vld [vmem:[#allocation2] sm:$0xff] }
 0x1fa   : > { %v3870_v59 = vpack.c.bf16 %v1262_v58, %v1260_v54  ;;  %v1286_v60 = vpop.f32.mrf.mxu1 }
 0x1fb   : > { %v3885_v61 = vpack.c.bf16 %v1286_v60, %v1284_v55 }
 0x1fc   : > { %4065 = vst [vmem:[#allocation2 + $0x20] sm:$0xff] %v3870_v59  }
 0x1fd   : > { %4068 = vst [vmem:[#allocation2 + $0x38] sm:$0xff] %v3885_v61  }
 0x1ff   : > { %v1238_v62 = vpop.f32.mrf.mxu3 }
 0x200   : > { %v3855_v63 = vpack.c.bf16 %v1238_v62, %v1236_v56  ;;  %v1310_v0 = vpop.f32.mrf.mxu2  ;;  %v3273_v56 = vor.u32 %v3756_v53, %v3272_v52  ;;  %v4326_v62 = vmov 0   ;;  %v3772_v52 = vld [vmem:[#allocation3 + $0xac] sm:$0xf0] }
 0x201   : > { %v3900_v1 = vpack.c.bf16 %v1310_v0, %v1308_v57  ;;  %374 = vst [vmem:[#allocation2 + $0xf8] sm:$0xf] %v4326_v62 }
 0x202   : > { %4062 = vst [vmem:[#allocation2 + $0x8] sm:$0xff] %v3855_v63  }
 0x203   : > { %4071 = vst [vmem:[#allocation2 + $0x50] sm:$0xff] %v3900_v1   ;;  %v3818_v20 = vld [vmem:[#allocation2 + $0x20] sm:$0xff] }
 0x204   : > { %1427 = vmatmul.bf16.gmra.mxu3 %v4614_v24  ;;  %v3821_v2 = vld [vmem:[#allocation2 + $0x38] sm:$0xff]  ;;  %375 = vst [vmem:[#allocation2 + $0xfc] sm:$0xf] %v4326_v62 }
 0x205   : > { %2186 = vmatpush.bf16.msrb.mxu0 %v3821_v2  ;;  %366 = vst [vmem:[#allocation2 + $0xd8] sm:$0xf] %v4326_v62  ;;  %v3288_v2 = vld [vmem:[#allocation3 + $0x40] sm:$0xf] }
 0x206   : > { %367 = vst [vmem:[#allocation2 + $0xdc] sm:$0xf] %v4326_v62 }
 0x207   : > { %368 = vst [vmem:[#allocation2 + $0xe0] sm:$0xf] %v4326_v62 }
 0x208   : > { %369 = vst [vmem:[#allocation2 + $0xe4] sm:$0xf] %v4326_v62 }
 0x209   : > { %2187 = vmatpush.bf16.msrb.mxu0 %v3820_v3  ;;  %v3815_v34 = vld [vmem:[#allocation2 + $0x8] sm:$0xff]  ;;  %v3760_v3 = vld [vmem:[#allocation3 + $0x4c] sm:$0xf0]  ;;  %370 = vst [vmem:[#allocation2 + $0xe8] sm:$0xf] %v4326_v62 }
 0x20a   : > { %371 = vst [vmem:[#allocation2 + $0xec] sm:$0xf] %v4326_v62 }
 0x20b   : > { %372 = vst [vmem:[#allocation2 + $0xf0] sm:$0xf] %v4326_v62 }
 0x20c   : > { %373 = vst [vmem:[#allocation2 + $0xf4] sm:$0xf] %v4326_v62 }
 0x214   : > { %1432 = vmatmul.bf16.gmra.mxu3 %v4632_v19 }
 0x231   : > { %v1265_v9 = vpop.f32.mrf.mxu0 }
 0x232   : > { %v1289_v4 = vpop.f32.mrf.mxu1 }
 0x237   : > { %v1241_v5 = vpop.f32.mrf.mxu3 }
 0x238   : > { %v1313_v6 = vpop.f32.mrf.mxu2 }
 0x239   : > { %v1267_v7 = vpop.f32.mrf.mxu0 }
 0x23a   : > { %v3875_v8 = vpack.c.bf16 %v1267_v7, %v1265_v9  ;;  %v1291_v10 = vpop.f32.mrf.mxu1 }
 0x23b   : > { %v3890_v11 = vpack.c.bf16 %v1291_v10, %v1289_v4  ;;  %v4653_v4 = vld [vmem:[#allocation2 + $0xf8] sm:$0xff] }
 0x23c   : > { %4066 = vst [vmem:[#allocation2 + $0x28] sm:$0xff] %v3875_v8   ;;  %4111 = vmatpush.bf16.msra.mxu3 %v4653_v4 }
 0x23d   : > { %4069 = vst [vmem:[#allocation2 + $0x40] sm:$0xff] %v3890_v11  }
 0x23f   : > { %v1243_v12 = vpop.f32.mrf.mxu3 }
 0x240   : > { %v3860_v13 = vpack.c.bf16 %v1243_v12, %v1241_v5  ;;  %v1315_v14 = vpop.f32.mrf.mxu2 }
 0x241   : > { %v3905_v24 = vpack.c.bf16 %v1315_v14, %v1313_v6  ;;  %v1351_v15 = vpop.f32.mrf.mxu0  ;;  %v3289_v6 = vor.u32 %v3760_v3, %v3288_v2  ;;  %v3844_v14 = vld [vmem:[#allocation2 + $0xf0] sm:$0xff]  ;;  %v3352_v2 = vld [vmem:[#allocation3 + $0xc0] sm:$0xf] }
 0x242   : > { %4063 = vst [vmem:[#allocation2 + $0x10] sm:$0xff] %v3860_v13   ;;  %v1375_v16 = vpop.f32.mrf.mxu1  ;;  %4112 = vmatpush.bf16.msra.mxu3 %v3844_v14  ;;  %v3776_v3 = vld [vmem:[#allocation3 + $0xcc] sm:$0xf0] }
 0x243   : > { %4072 = vst [vmem:[#allocation2 + $0x58] sm:$0xff] %v3905_v24   ;;  %v3819_v17 = vld [vmem:[#allocation2 + $0x28] sm:$0xff] }
 0x244   : > { %2188 = vmatpush.bf16.msrb.mxu0 %v3819_v17 }
 0x247   : > { %v1327_v18 = vpop.f32.mrf.mxu3 }
 0x248   : > { %v1399_v21 = vpop.f32.mrf.mxu2  ;;  %2189 = vmatpush.bf16.msrb.mxu0 %v3818_v20  ;;  %v3764_v20 = vld [vmem:[#allocation3 + $0x6c] sm:$0xf0] }
 0x249   : > { %v1353_v22 = vpop.f32.mrf.mxu0  ;;  %v3816_v28 = vld [vmem:[#allocation2 + $0x10] sm:$0xff] }
 0x24a   : > { %v3925_v19 = vpack.c.bf16 %v1353_v22, %v1351_v15  ;;  %v1377_v23 = vpop.f32.mrf.mxu1  ;;  %v3843_v15 = vld [vmem:[#allocation2 + $0xe8] sm:$0xff]  ;;  %v3842_v22 = vld [vmem:[#allocation2 + $0xe0] sm:$0xff] }
 0x24b   : > { %v3940_v25 = vpack.c.bf16 %v1377_v23, %v1375_v16  ;;  %v3825_v16 = vld [vmem:[#allocation2 + $0x58] sm:$0xff]  ;;  %4113 = vmatpush.bf16.msra.mxu3 %v3843_v15 }
 0x24c   : > { %4076 = vst [vmem:[#allocation2 + $0x78] sm:$0xff] %v3925_v19   ;;  %2190 = vmatpush.bf16.msrb.mxu0 %v3817_v27  ;;  %v3824_v19 = vld [vmem:[#allocation2 + $0x50] sm:$0xff]  ;;  %v3841_v27 = vld [vmem:[#allocation2 + $0xd8] sm:$0xff] }
 0x24d   : > { %4079 = vst [vmem:[#allocation2 + $0x90] sm:$0xff] %v3940_v25  }
 0x24f   : > { %v1329_v26 = vpop.f32.mrf.mxu3  ;;  %4114 = vmatpush.bf16.msra.mxu3 %v3842_v22 }
 0x250   : > { %v3910_v29 = vpack.c.bf16 %v1329_v26, %v1327_v18  ;;  %v1401_v30 = vpop.f32.mrf.mxu2  ;;  %2191 = vmatpush.bf16.msrb.mxu0 %v3816_v28  ;;  %v3304_v18 = vld [vmem:[#allocation3 + $0x60] sm:$0xf]  ;;  %v3823_v26 = vld [vmem:[#allocation2 + $0x48] sm:$0xff] }
 0x251   : > { %v3955_v31 = vpack.c.bf16 %v1401_v30, %v1399_v21  ;;  %v1356_v32 = vpop.f32.mrf.mxu0  ;;  %v3305_v23 = vor.u32 %v3764_v20, %v3304_v18  ;;  %v3750_v30 = vld [vmem:[#allocation3 + $0x4] sm:$0xf]  ;;  %v3322_v18 = vld [vmem:[#allocation3 + $0x90] sm:$0xf0]  ;;  %v3763_v20 = vld [vmem:[#allocation3 + $0x6c] sm:$0xf] }
 0x252   : > { %4073 = vst [vmem:[#allocation2 + $0x60] sm:$0xff] %v3910_v29   ;;  %v1380_v33 = vpop.f32.mrf.mxu1 }
 0x253   : > { %4082 = vst [vmem:[#allocation2 + $0xa8] sm:$0xff] %v3955_v31   ;;  %v3829_v35 = vld [vmem:[#allocation2 + $0x78] sm:$0xff]  ;;  %v3258_v31 = vld [vmem:[#allocation3 + $0x10] sm:$0xf0]  ;;  %4115 = vmatpush.bf16.msra.mxu3 %v3841_v27 }
 0x254   : > { %2192 = vmatpush.bf16.msrb.mxu0 %v3815_v34  ;;  %2275 = vmatpush.bf16.msrb.mxu1 %v3829_v35  ;;  %v3832_v28 = vld [vmem:[#allocation2 + $0x90] sm:$0xff]  ;;  %v3261_v35 = vor.u32 %v3750_v30, %v3258_v31  ;;  %v3770_v31 = vld [vmem:[#allocation3 + $0xa4] sm:$0xf] }
 0x257   : > { %v1332_v38 = vpop.f32.mrf.mxu3 }
 0x258   : > { %v1404_v40 = vpop.f32.mrf.mxu2  ;;  %2193 = vmatpush.bf16.msrb.mxu0 %v3814_v39  ;;  %v3320_v39 = vld [vmem:[#allocation3 + $0x80] sm:$0xf] }
 0x259   : > { %v1358_v42 = vpop.f32.mrf.mxu0  ;;  %v3826_v13 = vld [vmem:[#allocation2 + $0x60] sm:$0xff] }
 0x25a   : > { %v3930_v43 = vpack.c.bf16 %v1358_v42, %v1356_v32  ;;  %v1382_v44 = vpop.f32.mrf.mxu1  ;;  %v3835_v24 = vld [vmem:[#allocation2 + $0xa8] sm:$0xff]  ;;  %v3281_v42 = vor.u32 %v3757_v37, %v3280_v36 }
 0x25b   : > { %v3945_v45 = vpack.c.bf16 %v1382_v44, %v1380_v33  ;;  %2194 = vmatmul.bf16.vlgmr.msrb.gmra.mxu0 %v3257_v41  ;;  %v3822_v33 = vld [vmem:[#allocation2 + $0x40] sm:$0xff] }
 0x25c   : > { %4077 = vst [vmem:[#allocation2 + $0x80] sm:$0xff] %v3930_v43  }
 0x25d   : > { %4080 = vst [vmem:[#allocation2 + $0x98] sm:$0xff] %v3945_v45   ;;  %v3754_v45 = vld [vmem:[#allocation3 + $0x24] sm:$0xf] }
 0x25f   : > { %v1334_v46 = vpop.f32.mrf.mxu3 }
 0x260   : > { %v3915_v47 = vpack.c.bf16 %v1334_v46, %v1332_v38  ;;  %v1406_v48 = vpop.f32.mrf.mxu2  ;;  %v3274_v46 = vld [vmem:[#allocation3 + $0x30] sm:$0xf0] }
 0x261   : > { %v3960_v49 = vpack.c.bf16 %v1406_v48, %v1404_v40  ;;  %v1361_v50 = vpop.f32.mrf.mxu0  ;;  %v3768_v40 = vld [vmem:[#allocation3 + $0x8c] sm:$0xf0]  ;;  %v3277_v48 = vor.u32 %v3754_v45, %v3274_v46  ;;  %v3774_v45 = vld [vmem:[#allocation3 + $0xc4] sm:$0xf]  ;;  %v3354_v46 = vld [vmem:[#allocation3 + $0xd0] sm:$0xf0] }
 0x262   : > { %4074 = vst [vmem:[#allocation2 + $0x68] sm:$0xff] %v3915_v47   ;;  %v1385_v51 = vpop.f32.mrf.mxu1  ;;  %v3321_v43 = vor.u32 %v3768_v40, %v3320_v39  ;;  %v3777_v39 = vld [vmem:[#allocation3 + $0xd4] sm:$0xf0]  ;;  %v3400_v40 = vld [vmem:[#allocation3 + $0x120] sm:$0xf] }
 0x263   : > { %4083 = vst [vmem:[#allocation2 + $0xb0] sm:$0xff] %v3960_v49   ;;  %v3830_v38 = vld [vmem:[#allocation2 + $0x80] sm:$0xff]  ;;  %v3296_v49 = vld [vmem:[#allocation3 + $0x48] sm:$0xf] }
 0x264   : > { %v3833_v25 = vld [vmem:[#allocation2 + $0x98] sm:$0xff] }
 0x267   : > { %v1337_v54 = vpop.f32.mrf.mxu3 }
 0x268   : > { %v1409_v55 = vpop.f32.mrf.mxu2 }
 0x269   : > { %v1363_v57 = vpop.f32.mrf.mxu0  ;;  %v3827_v8 = vld [vmem:[#allocation2 + $0x68] sm:$0xff] }
 0x26a   : > { %v3935_v58 = vpack.c.bf16 %v1363_v57, %v1361_v50  ;;  %v1387_v59 = vpop.f32.mrf.mxu1  ;;  %v3836_v10 = vld [vmem:[#allocation2 + $0xb0] sm:$0xff]  ;;  %v3761_v50 = vld [vmem:[#allocation3 + $0x54] sm:$0xf0]  ;;  %v3758_v57 = vld [vmem:[#allocation3 + $0x44] sm:$0xf] }
 0x26b   : > { %v3950_v60 = vpack.c.bf16 %v1387_v59, %v1385_v51  ;;  %2199 = vmatmul.bf16.gmra.mxu0 %v3273_v56  ;;  %v3336_v51 = vld [vmem:[#allocation3 + $0xa0] sm:$0xf]  ;;  %v3297_v53 = vor.u32 %v3761_v50, %v3296_v49  ;;  %v3755_v59 = vld [vmem:[#allocation3 + $0x2c] sm:$0xf]  ;;  %v3357_v50 = vor.u32 %v3774_v45, %v3354_v46  ;;  %v3790_v45 = vld [vmem:[#allocation3 + $0x144] sm:$0xf] }
 0x26c   : > { %4078 = vst [vmem:[#allocation2 + $0x88] sm:$0xff] %v3935_v58   ;;  %v3290_v58 = vld [vmem:[#allocation3 + $0x50] sm:$0xf0] }
 0x26d   : > { %4081 = vst [vmem:[#allocation2 + $0xa0] sm:$0xff] %v3950_v60   ;;  %v3282_v60 = vld [vmem:[#allocation3 + $0x38] sm:$0xf0]  ;;  %v3293_v62 = vor.u32 %v3758_v57, %v3290_v58  ;;  %v3418_v46 = vld [vmem:[#allocation3 + $0x150] sm:$0xf0] }
 0x26f   : > { %v1339_v61 = vpop.f32.mrf.mxu3 }
 0x270   : > { %v3920_v63 = vpack.c.bf16 %v1339_v61, %v1337_v54  ;;  %v1411_v0 = vpop.f32.mrf.mxu2 }
 0x271   : > { %v3965_v1 = vpack.c.bf16 %v1411_v0, %v1409_v55  ;;  %v3337_v55 = vor.u32 %v3772_v52, %v3336_v51  ;;  %v3312_v0 = vld [vmem:[#allocation3 + $0x68] sm:$0xf] }
 0x272   : > { %4075 = vst [vmem:[#allocation2 + $0x70] sm:$0xff] %v3920_v63   ;;  %v3285_v63 = vor.u32 %v3755_v59, %v3282_v60  ;;  %v3376_v52 = vld [vmem:[#allocation3 + $0xe8] sm:$0xf]  ;;  %v3778_v59 = vld [vmem:[#allocation3 + $0xe4] sm:$0xf] }
 0x273   : > { %4084 = vst [vmem:[#allocation2 + $0xb8] sm:$0xff] %v3965_v1   ;;  %v3831_v34 = vld [vmem:[#allocation2 + $0x88] sm:$0xff]  ;;  %v3765_v1 = vld [vmem:[#allocation3 + $0x74] sm:$0xf0]  ;;  %v3370_v60 = vld [vmem:[#allocation3 + $0xf0] sm:$0xf0] }
 0x274   : > { %v3834_v17 = vld [vmem:[#allocation2 + $0xa0] sm:$0xff] }
 0x277   : > { %v1423_v9 = vpop.f32.mrf.mxu3 }
 0x279   : > { %v3828_v5 = vld [vmem:[#allocation2 + $0x70] sm:$0xff] }
 0x27a   : > { %v3837_v7 = vld [vmem:[#allocation2 + $0xb8] sm:$0xff]  ;;  %2276 = vmatpush.bf16.msrb.mxu1 %v3828_v5  ;;  %v3762_v5 = vld [vmem:[#allocation3 + $0x64] sm:$0xf] }
 0x27b   : > { %2364 = vmatpush.bf16.msra.mxu0 %v3837_v7  ;;  %4103 = vmatpush.bf16.msra.mxu2 %v3837_v7  ;;  %v3759_v7 = vld [vmem:[#allocation3 + $0x4c] sm:$0xf] }
 0x27c   : > { %2204 = vmatmul.bf16.gmra.mxu0 %v3289_v6  ;;  %v3306_v6 = vld [vmem:[#allocation3 + $0x70] sm:$0xf0] }
 0x27e   : > { %2277 = vmatpush.bf16.msrb.mxu1 %v3827_v8  ;;  %v3298_v8 = vld [vmem:[#allocation3 + $0x58] sm:$0xf0] }
 0x27f   : > { %v1425_v11 = vpop.f32.mrf.mxu3  ;;  %2365 = vmatpush.bf16.msra.mxu0 %v3836_v10  ;;  %4104 = vmatpush.bf16.msra.mxu2 %v3836_v10  ;;  %v3309_v10 = vor.u32 %v3762_v5, %v3306_v6 }
 0x280   : > { %v3970_v12 = vpack.c.bf16 %v1425_v11, %v1423_v9  ;;  %v3313_v9 = vor.u32 %v3765_v1, %v3312_v0  ;;  %v3301_v11 = vor.u32 %v3759_v7, %v3298_v8  ;;  %v3373_v0 = vor.u32 %v3778_v59, %v3370_v60  ;;  %v3782_v8 = vld [vmem:[#allocation3 + $0x104] sm:$0xf]  ;;  %v3480_v59 = vld [vmem:[#allocation3 + $0x1c0] sm:$0xf]  ;;  %v3808_v60 = vld [vmem:[#allocation3 + $0x1cc] sm:$0xf0] }
 0x282   : > { %4085 = vst [vmem:[#allocation2 + $0xc0] sm:$0xff] %v3970_v12   ;;  %2278 = vmatpush.bf16.msrb.mxu1 %v3826_v13  ;;  %v3328_v12 = vld [vmem:[#allocation3 + $0x88] sm:$0xf]  ;;  %v3769_v13 = vld [vmem:[#allocation3 + $0x94] sm:$0xf0] }
 0x283   : > { %2366 = vmatpush.bf16.msra.mxu0 %v3835_v24  ;;  %4105 = vmatpush.bf16.msra.mxu2 %v3835_v24  ;;  %v3780_v24 = vld [vmem:[#allocation3 + $0xec] sm:$0xf0] }
 0x286   : > { %2279 = vmatpush.bf16.msrb.mxu1 %v3825_v16 }
 0x287   : > { %v1428_v21 = vpop.f32.mrf.mxu3  ;;  %2367 = vmatpush.bf16.msra.mxu0 %v3834_v17  ;;  %4106 = vmatpush.bf16.msra.mxu2 %v3834_v17  ;;  %v3766_v17 = vld [vmem:[#allocation3 + $0x84] sm:$0xf] }
 0x289   : > { %v3838_v61 = vld [vmem:[#allocation2 + $0xc0] sm:$0xff] }
 0x28a   : > { %2280 = vmatpush.bf16.msrb.mxu1 %v3824_v19 }
 0x28b   : > { %2368 = vmatpush.bf16.msra.mxu0 %v3833_v25  ;;  %4107 = vmatpush.bf16.msra.mxu2 %v3833_v25  ;;  %v3773_v25 = vld [vmem:[#allocation3 + $0xb4] sm:$0xf0] }
 0x28c   : > { %2209 = vmatmul.bf16.gmra.mxu0 %v3305_v23  ;;  %v3344_v23 = vld [vmem:[#allocation3 + $0xa8] sm:$0xf] }
 0x28e   : > { %2281 = vmatpush.bf16.msrb.mxu1 %v3823_v26  ;;  %v3784_v26 = vld [vmem:[#allocation3 + $0x10c] sm:$0xf0] }
 0x28f   : > { %v1430_v29 = vpop.f32.mrf.mxu3  ;;  %2369 = vmatpush.bf16.msra.mxu0 %v3832_v28  ;;  %4108 = vmatpush.bf16.msra.mxu2 %v3832_v28  ;;  %v3345_v28 = vor.u32 %v3773_v25, %v3344_v23 }
 0x290   : > { %v3975_v32 = vpack.c.bf16 %v1430_v29, %v1428_v21  ;;  %v3314_v21 = vld [vmem:[#allocation3 + $0x78] sm:$0xf0] }
 0x291   : > { %v3317_v19 = vor.u32 %v3763_v20, %v3314_v21  ;;  %v3448_v20 = vld [vmem:[#allocation3 + $0x180] sm:$0xf]  ;;  %v3800_v21 = vld [vmem:[#allocation3 + $0x18c] sm:$0xf0] }
 0x292   : > { %4086 = vst [vmem:[#allocation2 + $0xc8] sm:$0xff] %v3975_v32   ;;  %2282 = vmatpush.bf16.msrb.mxu1 %v3822_v33  ;;  %v3338_v32 = vld [vmem:[#allocation3 + $0xb0] sm:$0xf0]  ;;  %v3767_v33 = vld [vmem:[#allocation3 + $0x8c] sm:$0xf] }
 0x293   : > { %2370 = vmatpush.bf16.msra.mxu0 %v3831_v34  ;;  %4109 = vmatpush.bf16.msra.mxu2 %v3831_v34  ;;  %v3330_v34 = vld [vmem:[#allocation3 + $0x98] sm:$0xf0]  ;;  %v3341_v36 = vor.u32 %v3770_v31, %v3338_v32 }
 0x294   : > { %v3333_v37 = vor.u32 %v3767_v33, %v3330_v34  ;;  %v3394_v31 = vld [vmem:[#allocation3 + $0x118] sm:$0xf0] }
 0x295   : > { %2283 = vmatmul.bf16.vlgmr.msrb.gmra.mxu1 %v3261_v35 }
 0x296   : > { %2453 = vmatpush.bf16.msra.mxu1 %v4653_v4  ;;  %v3353_v4 = vor.u32 %v3776_v3, %v3352_v2  ;;  %v3392_v2 = vld [vmem:[#allocation3 + $0x108] sm:$0xf]  ;;  %v3785_v3 = vld [vmem:[#allocation3 + $0x114] sm:$0xf0] }
 0x297   : > { %v1433_v41 = vpop.f32.mrf.mxu3  ;;  %2371 = vmatpush.bf16.msra.mxu0 %v3830_v38  ;;  %4110 = vmatpush.bf16.msra.mxu2 %v3830_v38  ;;  %v3360_v38 = vld [vmem:[#allocation3 + $0xc8] sm:$0xf]  ;;  %v3393_v5 = vor.u32 %v3785_v3, %v3392_v2 }
 0x299   : > { %v3839_v56 = vld [vmem:[#allocation2 + $0xc8] sm:$0xff] }
 0x29a   : > { %2454 = vmatpush.bf16.msra.mxu1 %v3844_v14  ;;  %2377 = vmatmul.bf16.vlgmr.msra.gmra.mxu2 %v3281_v42  ;;  %v3368_v14 = vld [vmem:[#allocation3 + $0xe0] sm:$0xf]  ;;  %v3361_v42 = vor.u32 %v3777_v39, %v3360_v38  ;;  %v3804_v39 = vld [vmem:[#allocation3 + $0x1ac] sm:$0xf0] }
 0x29b   : > { %v3369_v16 = vor.u32 %v3780_v24, %v3368_v14  ;;  %v3464_v38 = vld [vmem:[#allocation3 + $0x1a0] sm:$0xf] }
 0x29c   : > { %2214 = vmatmul.bf16.gmra.mxu0 %v3321_v43 }
 0x29e   : > { %2455 = vmatpush.bf16.msra.mxu1 %v3843_v15  ;;  %v3329_v15 = vor.u32 %v3769_v13, %v3328_v12  ;;  %v3378_v12 = vld [vmem:[#allocation3 + $0xf8] sm:$0xf0] }
 0x29f   : > { %v1435_v44 = vpop.f32.mrf.mxu3 }
 0x2a0   : > { %v3980_v47 = vpack.c.bf16 %v1435_v44, %v1433_v41  ;;  %v3788_v41 = vld [vmem:[#allocation3 + $0x12c] sm:$0xf0] }
 0x2a1   : > { %v3401_v44 = vor.u32 %v3788_v41, %v3400_v40 }
 0x2a2   : > { %2456 = vmatpush.bf16.msra.mxu1 %v3842_v22  ;;  %4087 = vst [vmem:[#allocation2 + $0xd0] sm:$0xff] %v3980_v47   ;;  %v3325_v22 = vor.u32 %v3766_v17, %v3322_v18  ;;  %v3771_v47 = vld [vmem:[#allocation3 + $0xac] sm:$0xf]  ;;  %v3408_v17 = vld [vmem:[#allocation3 + $0x128] sm:$0xf] }
 0x2a3   : > { %v3789_v18 = vld [vmem:[#allocation3 + $0x134] sm:$0xf0] }
 0x2a5   : > { %2288 = vmatmul.bf16.gmra.mxu1 %v3277_v48  ;;  %v3346_v48 = vld [vmem:[#allocation3 + $0xb8] sm:$0xf0] }
 0x2a6   : > { %2457 = vmatpush.bf16.msra.mxu1 %v3841_v27  ;;  %v3384_v27 = vld [vmem:[#allocation3 + $0x100] sm:$0xf]  ;;  %v3349_v51 = vor.u32 %v3771_v47, %v3346_v48  ;;  %v3787_v47 = vld [vmem:[#allocation3 + $0x12c] sm:$0xf]  ;;  %v3410_v48 = vld [vmem:[#allocation3 + $0x138] sm:$0xf0] }
 0x2a7   : > { %v3385_v30 = vor.u32 %v3784_v26, %v3384_v27  ;;  %v3786_v26 = vld [vmem:[#allocation3 + $0x124] sm:$0xf] }
 0x2a9   : > { %v3840_v54 = vld [vmem:[#allocation2 + $0xd0] sm:$0xff] }
 0x2aa   : > { %2458 = vmatpush.bf16.msra.mxu1 %v3840_v54  ;;  %4116 = vmatpush.bf16.msra.mxu3 %v3840_v54  ;;  %v3416_v54 = vld [vmem:[#allocation3 + $0x140] sm:$0xf] }
 0x2ab   : > { %2382 = vmatmul.bf16.gmra.mxu2 %v3297_v53  ;;  %v3781_v53 = vld [vmem:[#allocation3 + $0xf4] sm:$0xf0] }
 0x2ac   : > { %2219 = vmatmul.bf16.gmra.mxu0 %v3337_v55  ;;  %v3792_v55 = vld [vmem:[#allocation3 + $0x14c] sm:$0xf0] }
 0x2ad   : > { %v3417_v57 = vor.u32 %v3792_v55, %v3416_v54  ;;  %v3440_v55 = vld [vmem:[#allocation3 + $0x168] sm:$0xf] }
 0x2ae   : > { %2459 = vmatpush.bf16.msra.mxu1 %v3839_v56  ;;  %4117 = vmatpush.bf16.msra.mxu3 %v3839_v56  ;;  %v3377_v56 = vor.u32 %v3781_v53, %v3376_v52  ;;  %v3421_v52 = vor.u32 %v3790_v45, %v3418_v46  ;;  %v3413_v53 = vor.u32 %v3787_v47, %v3410_v48  ;;  %v3798_v45 = vld [vmem:[#allocation3 + $0x184] sm:$0xf]  ;;  %v3450_v47 = vld [vmem:[#allocation3 + $0x190] sm:$0xf0]  ;;  %v3795_v48 = vld [vmem:[#allocation3 + $0x16c] sm:$0xf] }
 0x2b2   : > { %2460 = vmatpush.bf16.msra.mxu1 %v3838_v61  ;;  %4118 = vmatpush.bf16.msra.mxu3 %v3838_v61  ;;  %v3775_v61 = vld [vmem:[#allocation3 + $0xcc] sm:$0xf] }
 0x2b5   : > { %2293 = vmatmul.bf16.gmra.mxu1 %v3293_v62  ;;  %2466 = vmatmul.bf16.vlgmr.msra.gmra.mxu3 %v3285_v63  ;;  %v3362_v62 = vld [vmem:[#allocation3 + $0xd8] sm:$0xf0] }
 0x2b6   : > { %v3365_v1 = vor.u32 %v3775_v61, %v3362_v62 }
 0x2bb   : > { %2387 = vmatmul.bf16.gmra.mxu2 %v3313_v9  ;;  %v3432_v9 = vld [vmem:[#allocation3 + $0x160] sm:$0xf] }
 0x2bc   : > { %2224 = vmatmul.bf16.gmra.mxu0 %v3353_v4  ;;  %v3796_v4 = vld [vmem:[#allocation3 + $0x16c] sm:$0xf0] }
 0x2bd   : > { %v3433_v6 = vor.u32 %v3796_v4, %v3432_v9 }
 0x2c5   : > { %2298 = vmatmul.bf16.gmra.mxu1 %v3309_v10  ;;  %2471 = vmatmul.bf16.gmra.mxu3 %v3301_v11  ;;  %v3386_v10 = vld [vmem:[#allocation3 + $0x110] sm:$0xf0]  ;;  %v3779_v11 = vld [vmem:[#allocation3 + $0xec] sm:$0xf] }
 0x2c6   : > { %v3389_v13 = vor.u32 %v3782_v8, %v3386_v10  ;;  %v3381_v14 = vor.u32 %v3779_v11, %v3378_v12  ;;  %v3434_v8 = vld [vmem:[#allocation3 + $0x170] sm:$0xf0]  ;;  %v3791_v10 = vld [vmem:[#allocation3 + $0x14c] sm:$0xf]  ;;  %v3426_v11 = vld [vmem:[#allocation3 + $0x158] sm:$0xf0] }
 0x2cb   : > { %2392 = vmatmul.bf16.gmra.mxu2 %v3329_v15 }
 0x2cc   : > { %2229 = vmatmul.bf16.gmra.mxu0 %v3369_v16 }
 0x2d5   : > { %2303 = vmatmul.bf16.gmra.mxu1 %v3325_v22  ;;  %2476 = vmatmul.bf16.gmra.mxu3 %v3317_v19  ;;  %v3409_v22 = vor.u32 %v3789_v18, %v3408_v17  ;;  %v3449_v19 = vor.u32 %v3800_v21, %v3448_v20  ;;  %v3429_v20 = vor.u32 %v3791_v10, %v3426_v11 }
 0x2d8   : > { %v4657_v29 = vpop.f32.mrf.mxu0 }
 0x2db   : > { %2397 = vmatmul.bf16.gmra.mxu2 %v3345_v28 }
 0x2dc   : > { %2234 = vmatmul.bf16.gmra.mxu0 %v3385_v30  ;;  %v3783_v30 = vld [vmem:[#allocation3 + $0x10c] sm:$0xf] }
 0x2dd   : > { %v3397_v33 = vor.u32 %v3783_v30, %v3394_v31  ;;  %v3496_v31 = vld [vmem:[#allocation3 + $0x1e0] sm:$0xf] }
 0x2e0   : > { %v4659_v35 = vpop.f32.mrf.mxu0 }
 0x2e5   : > { %2308 = vmatmul.bf16.gmra.mxu1 %v3341_v36  ;;  %2481 = vmatmul.bf16.gmra.mxu3 %v3333_v37  ;;  %v3424_v36 = vld [vmem:[#allocation3 + $0x148] sm:$0xf]  ;;  %v3793_v37 = vld [vmem:[#allocation3 + $0x154] sm:$0xf0] }
 0x2e6   : > { %v3425_v41 = vor.u32 %v3793_v37, %v3424_v36 }
 0x2e8   : > { %v4661_v43 = vpop.f32.mrf.mxu0 }
 0x2eb   : > { %2402 = vmatmul.bf16.gmra.mxu2 %v3361_v42  ;;  %v3465_v42 = vor.u32 %v3804_v39, %v3464_v38 }
 0x2ec   : > { %2239 = vmatmul.bf16.gmra.mxu0 %v3401_v44 }
 0x2f0   : > { %v4663_v49 = vpop.f32.mrf.mxu0 }
 0x2f5   : > { %2313 = vmatmul.bf16.gmra.mxu1 %v3357_v50  ;;  %2486 = vmatmul.bf16.gmra.mxu3 %v3349_v51 }
 0x2f9   : > { %v4665_v58 = vpop.f32.mrf.mxu0 }
 0x2fb   : > { %2407 = vmatmul.bf16.gmra.mxu2 %v3377_v56  ;;  %v3797_v56 = vld [vmem:[#allocation3 + $0x174] sm:$0xf0] }
 0x2fc   : > { %2244 = vmatmul.bf16.gmra.mxu0 %v3417_v57  ;;  %v3441_v62 = vor.u32 %v3797_v56, %v3440_v55 }
 0x301   : > { %v4667_v63 = vpop.f32.mrf.mxu0 }
 0x305   : > { %2318 = vmatmul.bf16.gmra.mxu1 %v3373_v0  ;;  %2491 = vmatmul.bf16.gmra.mxu3 %v3365_v1  ;;  %v3481_v1 = vor.u32 %v3808_v60, %v3480_v59 }
 0x309   : > { %v4669_v7 = vpop.f32.mrf.mxu0 }
 0x30b   : > { %2412 = vmatmul.bf16.gmra.mxu2 %v3393_v5 }
 0x30c   : > { %2249 = vmatmul.bf16.gmra.mxu0 %v3433_v6  ;;  %v3794_v6 = vld [vmem:[#allocation3 + $0x164] sm:$0xf] }
 0x30d   : > { %v3437_v18 = vor.u32 %v3794_v6, %v3434_v8 }
 0x311   : > { %v4671_v24 = vpop.f32.mrf.mxu0 }
 0x312   : > { %v2284_v15 = vpop.f32.mrf.mxu1 }
 0x313   : > { %v4674_v16 = vadd.f32 %v2284_v15, %v4657_v29  ;;  %v3402_v29 = vld [vmem:[#allocation3 + $0x130] sm:$0xf0] }
 0x314   : > { %v3405_v32 = vor.u32 %v3786_v26, %v3402_v29  ;;  %v3456_v26 = vld [vmem:[#allocation3 + $0x188] sm:$0xf] }
 0x315   : > { %2323 = vmatmul.bf16.gmra.mxu1 %v3389_v13  ;;  %2496 = vmatmul.bf16.gmra.mxu3 %v3381_v14 }
 0x319   : > { %v4679_v27 = vpop.f32.mrf.mxu0 }
 0x31a   : > { %v2286_v23 = vpop.f32.mrf.mxu1 }
 0x31b   : > { %v4677_v25 = vadd.f32 %v2286_v23, %v4659_v35  ;;  %2417 = vmatmul.bf16.gmra.mxu2 %v3409_v22 }
 0x31c   : > { %2254 = vmatmul.bf16.gmra.mxu0 %v3449_v19 }
 0x31d   : > { %v2378_v28 = vpop.f32.mrf.mxu2 }
 0x321   : > { %v4681_v40 = vpop.f32.mrf.mxu0 }
 0x322   : > { %v2289_v34 = vpop.f32.mrf.mxu1 }
 0x323   : > { %v2290_v57 = vadd.f32 %v2289_v34, %v4661_v43  ;;  %v4692_v43 = vld [vmem:[%s4865_s7] ss:$0 sm:$0xff] }
 0x325   : > { %2328 = vmatmul.bf16.gmra.mxu1 %v3405_v32  ;;  %2501 = vmatmul.bf16.gmra.mxu3 %v3397_v33  ;;  %v2380_v35 = vpop.f32.mrf.mxu2  ;;  %v2379_v2 = vadd.f32 %v2378_v28, %v2290_v57  ;;  %v3801_v28 = vld [vmem:[#allocation3 + $0x194] sm:$0xf0]  ;;  %v3812_v32 = vld [vmem:[#allocation3 + $0x1ec] sm:$0xf0] }
 0x326   : > { %v3457_v37 = vor.u32 %v3801_v28, %v3456_v26  ;;  %v3497_v39 = vor.u32 %v3812_v32, %v3496_v31  ;;  %v3458_v26 = vld [vmem:[#allocation3 + $0x198] sm:$0xf0] }
 0x329   : > { %v4683_v51 = vpop.f32.mrf.mxu0 }
 0x32a   : > { %v2291_v44 = vpop.f32.mrf.mxu1 }
 0x32b   : > { %2422 = vmatmul.bf16.gmra.mxu2 %v3425_v41  ;;  %v2292_v4 = vadd.f32 %v2291_v44, %v4663_v49  ;;  %v4700_v49 = vld [vmem:[%s4866_s8] ss:$0 sm:$0xff] }
 0x32c   : > { %2259 = vmatmul.bf16.gmra.mxu0 %v3465_v42 }
 0x32d   : > { %v2381_v13 = vadd.f32 %v2380_v35, %v2292_v4  ;;  %v3753_v4 = vld [vmem:[#allocation3 + $0x14] sm:$0xf0] }
 0x32e   : > { %v2383_v50 = vpop.f32.mrf.mxu2 }
 0x331   : > { %v4686_v3 = vpop.f32.mrf.mxu0 }
 0x332   : > { %v2294_v54 = vpop.f32.mrf.mxu1 }
 0x333   : > { %v2295_v29 = vadd.f32 %v2294_v54, %v4665_v58 }
 0x335   : > { %2333 = vmatmul.bf16.gmra.mxu1 %v3421_v52  ;;  %2506 = vmatmul.bf16.gmra.mxu3 %v3413_v53  ;;  %v2384_v35 = vadd.f32 %v2383_v50, %v2295_v29  ;;  %v3442_v52 = vld [vmem:[#allocation3 + $0x178] sm:$0xf0] }
 0x336   : > { %v2385_v61 = vpop.f32.mrf.mxu2  ;;  %v3445_v57 = vor.u32 %v3795_v48, %v3442_v52 }
 0x338   : > { %v2467_v0 = vpop.f32.mrf.mxu3 }
 0x339   : > { %v2468_v5 = vadd.f32 %v2467_v0, %v2379_v2  ;;  %v4705_v23 = vpop.f32.mrf.mxu0  ;;  %v3472_v0 = vld [vmem:[#allocation3 + $0x1a8] sm:$0xf] }
 0x33a   : > { %v2296_v9 = vpop.f32.mrf.mxu1 }
 0x33b   : > { %2427 = vmatmul.bf16.gmra.mxu2 %v3441_v62  ;;  %v2548_v14 = vmul.f32 %v4692_v43, %v2468_v5  ;;  %v2297_v44 = vadd.f32 %v2296_v9, %v4667_v63  ;;  %v3453_v63 = vor.u32 %v3798_v45, %v3450_v47 }
 0x33c   : > { %2264 = vmatmul.bf16.gmra.mxu0 %v3481_v1  ;;  %v3805_v1 = vld [vmem:[#allocation3 + $0x1b4] sm:$0xf0] }
 0x33d   : > { %v2584_v22 = vadd.f32 %v4700_v49, %v2548_v14  ;;  %v2386_v54 = vadd.f32 %v2385_v61, %v2297_v44  ;;  %v3264_v61 = vld [vmem:[#allocation3 + $0x8] sm:$0xf]  ;;  %v3473_v10 = vor.u32 %v3805_v1, %v3472_v0 }
 0x33e   : > { %v4694_v12 = vpop.f32.mrf.mxu2  ;;  %v3265_v14 = vor.u32 %v3753_v4, %v3264_v61 }
 0x33f   : > { %v2616_v34 = vmax.f32 %v2584_v22, 0.0  ;;  %v3466_v22 = vld [vmem:[#allocation3 + $0x1b0] sm:$0xf0] }
 0x340   : > { %v2469_v15 = vpop.f32.mrf.mxu3 }
 0x341   : > { %v2470_v17 = vadd.f32 %v2469_v15, %v2381_v13  ;;  %v4715_v46 = vpop.f32.mrf.mxu0 }
 0x342   : > { %v2299_v21 = vpop.f32.mrf.mxu1 }
 0x343   : > { %v2549_v19 = vmul.f32 %v4692_v43, %v2470_v17  ;;  %v2300_v2 = vadd.f32 %v2299_v21, %v4669_v7  ;;  %v3802_v21 = vld [vmem:[#allocation3 + $0x1a4] sm:$0xf] }
 0x345   : > { %v2585_v30 = vadd.f32 %v4700_v49, %v2549_v19  ;;  %2338 = vmatmul.bf16.gmra.mxu1 %v3437_v18  ;;  %2511 = vmatmul.bf16.gmra.mxu3 %v3429_v20  ;;  %v2389_v15 = vadd.f32 %v4694_v12, %v2300_v2  ;;  %v3799_v19 = vld [vmem:[#allocation3 + $0x18c] sm:$0xf] }
 0x346   : > { %v2390_v33 = vpop.f32.mrf.mxu2  ;;  %v3461_v12 = vor.u32 %v3799_v19, %v3458_v26 }
 0x347   : > { %v2617_v36 = vmax.f32 %v2585_v30, 0.0 }
 0x348   : > { %v2472_v38 = vpop.f32.mrf.mxu3 }
 0x349   : > { %v3990_v41 = vpack.c.bf16 %v2617_v36, %v2616_v34  ;;  %v2473_v58 = vadd.f32 %v2472_v38, %v2384_v35  ;;  %v4722_v11 = vpop.f32.mrf.mxu0  ;;  %v3469_v34 = vor.u32 %v3802_v21, %v3466_v22  ;;  %v3809_v35 = vld [vmem:[#allocation3 + $0x1d4] sm:$0xf0] }
 0x34a   : > { %v2301_v42 = vpop.f32.mrf.mxu1 }
 0x34b   : > { %4088 = vst [vmem:[%s4712_s21 + $0x8] sm:$0xff] %v3990_v41   ;;  %2432 = vmatmul.bf16.gmra.mxu2 %v3457_v37  ;;  %v2550_v50 = vmul.f32 %v4692_v43, %v2473_v58  ;;  %v2302_v7 = vadd.f32 %v2301_v42, %v4671_v24 }
 0x34c   : > { %2269 = vmatmul.bf16.gmra.mxu0 %v3497_v39  ;;  %v3488_v39 = vld [vmem:[#allocation3 + $0x1c8] sm:$0xf] }
 0x34d   : > { %v2586_v60 = vadd.f32 %v4700_v49, %v2550_v50  ;;  %v2391_v29 = vadd.f32 %v2390_v33, %v2302_v7  ;;  %v3489_v45 = vor.u32 %v3809_v35, %v3488_v39 }
 0x34e   : > { %v2393_v53 = vpop.f32.mrf.mxu2 }
 0x34f   : > { %v2618_v6 = vmax.f32 %v2586_v60, 0.0 }
 0x350   : > { %v2474_v55 = vpop.f32.mrf.mxu3 }
 0x351   : > { %v2475_v56 = vadd.f32 %v2474_v55, %v2386_v54  ;;  %v4728_v36 = vpop.f32.mrf.mxu0 }
 0x352   : > { %v2304_v59 = vpop.f32.mrf.mxu1 }
 0x353   : > { %v2551_v62 = vmul.f32 %v4692_v43, %v2475_v56  ;;  %v2305_v41 = vadd.f32 %v2304_v59, %v4679_v27  ;;  %v3806_v27 = vld [vmem:[#allocation3 + $0x1c4] sm:$0xf]  ;;  %v3474_v59 = vld [vmem:[#allocation3 + $0x1b8] sm:$0xf0] }
 0x355   : > { %v2587_v9 = vadd.f32 %v4700_v49, %v2551_v62  ;;  %2343 = vmatmul.bf16.gmra.mxu1 %v3453_v63  ;;  %2516 = vmatmul.bf16.gmra.mxu3 %v3445_v57  ;;  %v2394_v48 = vadd.f32 %v2393_v53, %v2305_v41  ;;  %v3482_v63 = vld [vmem:[#allocation3 + $0x1d0] sm:$0xf0]  ;;  %v3803_v57 = vld [vmem:[#allocation3 + $0x1ac] sm:$0xf] }
 0x356   : > { %v2395_v5 = vpop.f32.mrf.mxu2  ;;  %v3485_v53 = vor.u32 %v3806_v27, %v3482_v63  ;;  %v3751_v63 = vld [vmem:[#allocation3 + $0xc] sm:$0xf] }
 0x357   : > { %v2619_v8 = vmax.f32 %v2587_v9, 0.0  ;;  %v3477_v9 = vor.u32 %v3803_v57, %v3474_v59  ;;  %v3266_v57 = vld [vmem:[#allocation3 + $0x18] sm:$0xf0] }
 0x358   : > { %v2477_v13 = vpop.f32.mrf.mxu3  ;;  %v3506_v59 = vld [vmem:[#allocation3 + $0x1f8] sm:$0xf0] }
 0x359   : > { %v3995_v17 = vpack.c.bf16 %v2619_v8, %v2618_v6  ;;  %v2478_v20 = vadd.f32 %v2477_v13, %v2389_v15  ;;  %v4736_v56 = vpop.f32.mrf.mxu0  ;;  %v3504_v6 = vld [vmem:[#allocation3 + $0x1e8] sm:$0xf]  ;;  %v3813_v8 = vld [vmem:[#allocation3 + $0x1f4] sm:$0xf0] }
 0x35a   : > { %v2306_v18 = vpop.f32.mrf.mxu1 }
 0x35b   : > { %4089 = vst [vmem:[%s4712_s21 + $0x10] sm:$0xff] %v3995_v17   ;;  %2437 = vmatmul.bf16.gmra.mxu2 %v3473_v10  ;;  %v2552_v30 = vmul.f32 %v4692_v43, %v2478_v20  ;;  %v2307_v50 = vadd.f32 %v2306_v18, %v4681_v40  ;;  %v3505_v18 = vor.u32 %v3813_v8, %v3504_v6 }
 0x35c   : > { %2372 = vmatmul.bf16.vlgmr.msra.gmra.mxu0 %v3265_v14 }
 0x35d   : > { %v2588_v24 = vadd.f32 %v4700_v49, %v2552_v30  ;;  %v2396_v62 = vadd.f32 %v2395_v5, %v2307_v50  ;;  %v3807_v30 = vld [vmem:[#allocation3 + $0x1cc] sm:$0xf] }
 0x35e   : > { %v2398_v28 = vpop.f32.mrf.mxu2 }
 0x35f   : > { %v2620_v44 = vmax.f32 %v2588_v24, 0.0 }
 0x360   : > { %v2479_v31 = vpop.f32.mrf.mxu3 }
 0x361   : > { %v2480_v32 = vadd.f32 %v2479_v31, %v2391_v29  ;;  %v4743_v5 = vpop.f32.mrf.mxu0  ;;  %v3498_v29 = vld [vmem:[#allocation3 + $0x1f0] sm:$0xf0]  ;;  %v3490_v31 = vld [vmem:[#allocation3 + $0x1d8] sm:$0xf0] }
 0x362   : > { %v2309_v37 = vpop.f32.mrf.mxu1  ;;  %v3493_v39 = vor.u32 %v3807_v30, %v3490_v31 }
 0x363   : > { %v2553_v38 = vmul.f32 %v4692_v43, %v2480_v32  ;;  %v2310_v10 = vadd.f32 %v2309_v37, %v4683_v51  ;;  %v3810_v51 = vld [vmem:[#allocation3 + $0x1e4] sm:$0xf] }
 0x365   : > { %v2589_v33 = vadd.f32 %v4700_v49, %v2553_v38  ;;  %2348 = vmatmul.bf16.gmra.mxu1 %v3469_v34  ;;  %2521 = vmatmul.bf16.gmra.mxu3 %v3461_v12  ;;  %v2399_v20 = vadd.f32 %v2398_v28, %v2310_v10  ;;  %v3501_v28 = vor.u32 %v3810_v51, %v3498_v29 }
 0x366   : > { %v2400_v42 = vpop.f32.mrf.mxu2 }
 0x367   : > { %v2621_v58 = vmax.f32 %v2589_v33, 0.0 }
 0x368   : > { %v2482_v47 = vpop.f32.mrf.mxu3 }
 0x369   : > { %v4000_v52 = vpack.c.bf16 %v2621_v58, %v2620_v44  ;;  %v2483_v55 = vadd.f32 %v2482_v47, %v2394_v48  ;;  %v4748_v37 = vpop.f32.mrf.mxu0 }
 0x36a   : > { %v2311_v54 = vpop.f32.mrf.mxu1 }
 0x36b   : > { %4090 = vst [vmem:[%s4712_s21 + $0x18] sm:$0xff] %v4000_v52   ;;  %2442 = vmatmul.bf16.gmra.mxu2 %v3489_v45  ;;  %v2554_v0 = vmul.f32 %v4692_v43, %v2483_v55  ;;  %v2312_v19 = vadd.f32 %v2311_v54, %v4686_v3 }
 0x36d   : > { %v2590_v40 = vadd.f32 %v4700_v49, %v2554_v0  ;;  %v2401_v34 = vadd.f32 %v2400_v42, %v2312_v19 }
 0x36e   : > { %v2403_v60 = vpop.f32.mrf.mxu2 }
 0x36f   : > { %v2622_v15 = vmax.f32 %v2590_v40, 0.0 }
 0x370   : > { %v2484_v1 = vpop.f32.mrf.mxu3 }
 0x371   : > { %v2485_v2 = vadd.f32 %v2484_v1, %v2396_v62  ;;  %v4754_v54 = vpop.f32.mrf.mxu0 }
 0x372   : > { %v2314_v61 = vpop.f32.mrf.mxu1 }
 0x373   : > { %v2555_v4 = vmul.f32 %v4692_v43, %v2485_v2  ;;  %v2315_v33 = vadd.f32 %v2314_v61, %v4705_v23  ;;  %v3811_v23 = vld [vmem:[#allocation3 + $0x1ec] sm:$0xf] }
 0x375   : > { %v2591_v13 = vadd.f32 %v4700_v49, %v2555_v4  ;;  %2353 = vmatmul.bf16.gmra.mxu1 %v3485_v53  ;;  %2526 = vmatmul.bf16.gmra.mxu3 %v3477_v9  ;;  %v2404_v48 = vadd.f32 %v2403_v60, %v2315_v33  ;;  %v3269_v9 = vor.u32 %v3751_v63, %v3266_v57 }
 0x376   : > { %v2405_v14 = vpop.f32.mrf.mxu2  ;;  %v3509_v60 = vor.u32 %v3811_v23, %v3506_v59 }
 0x377   : > { %v2623_v17 = vmax.f32 %v2591_v13, 0.0 }
 0x378   : > { %v2487_v7 = vpop.f32.mrf.mxu3 }
 0x379   : > { %v4005_v21 = vpack.c.bf16 %v2623_v17, %v2622_v15  ;;  %v2488_v26 = vadd.f32 %v2487_v7, %v2399_v20  ;;  %v4761_v4 = vpop.f32.mrf.mxu0 }
 0x37a   : > { %v2316_v22 = vpop.f32.mrf.mxu1 }
 0x37b   : > { %4091 = vst [vmem:[%s4712_s21 + $0x20] sm:$0xff] %v4005_v21   ;;  %2447 = vmatmul.bf16.gmra.mxu2 %v3505_v18  ;;  %v2556_v12 = vmul.f32 %v4692_v43, %v2488_v26  ;;  %v2317_v55 = vadd.f32 %v2316_v22, %v4715_v46 }
 0x37d   : > { %v2592_v3 = vadd.f32 %v4700_v49, %v2556_v12  ;;  %v2406_v0 = vadd.f32 %v2405_v14, %v2317_v55 }
 0x37e   : > { %v2408_v32 = vpop.f32.mrf.mxu2 }
 0x37f   : > { %v2624_v58 = vmax.f32 %v2592_v3, 0.0 }
 0x380   : > { %v2489_v24 = vpop.f32.mrf.mxu3 }
 0x381   : > { %v2490_v38 = vadd.f32 %v2489_v24, %v2401_v34  ;;  %v2247_v22 = vpop.f32.mrf.mxu0 }
 0x382   : > { %v2319_v35 = vpop.f32.mrf.mxu1 }
 0x383   : > { %v2557_v41 = vmul.f32 %v4692_v43, %v2490_v38  ;;  %v2320_v6 = vadd.f32 %v2319_v35, %v4722_v11 }
 0x385   : > { %v2593_v44 = vadd.f32 %v4700_v49, %v2557_v41  ;;  %2358 = vmatmul.bf16.gmra.mxu1 %v3501_v28  ;;  %2531 = vmatmul.bf16.gmra.mxu3 %v3493_v39  ;;  %v2409_v17 = vadd.f32 %v2408_v32, %v2320_v6 }
 0x386   : > { %v2410_v42 = vpop.f32.mrf.mxu2 }
 0x387   : > { %v2625_v45 = vmax.f32 %v2593_v44, 0.0 }
 0x388   : > { %v2492_v47 = vpop.f32.mrf.mxu3 }
 0x389   : > { %v4010_v52 = vpack.c.bf16 %v2625_v45, %v2624_v58  ;;  %v2493_v27 = vadd.f32 %v2492_v47, %v2404_v48  ;;  %v2250_v28 = vpop.f32.mrf.mxu0 }
 0x38a   : > { %v2321_v50 = vpop.f32.mrf.mxu1 }
 0x38b   : > { %4092 = vst [vmem:[%s4712_s21 + $0x28] sm:$0xff] %v4010_v52   ;;  %v2558_v1 = vmul.f32 %v4692_v43, %v2493_v27  ;;  %v2322_v20 = vadd.f32 %v2321_v50, %v4728_v36 }
 0x38d   : > { %v2594_v40 = vadd.f32 %v4700_v49, %v2558_v1  ;;  %v2411_v26 = vadd.f32 %v2410_v42, %v2322_v20 }
 0x38e   : > { %v2413_v62 = vpop.f32.mrf.mxu2 }
 0x38f   : > { %v2626_v13 = vmax.f32 %v2594_v40, 0.0 }
 0x390   : > { %v2494_v2 = vpop.f32.mrf.mxu3 }
 0x391   : > { %v2495_v53 = vadd.f32 %v2494_v2, %v2406_v0  ;;  %v2252_v48 = vpop.f32.mrf.mxu0 }
 0x392   : > { %v2324_v61 = vpop.f32.mrf.mxu1 }
 0x393   : > { %v2559_v46 = vmul.f32 %v4692_v43, %v2495_v53  ;;  %v2325_v32 = vadd.f32 %v2324_v61, %v4736_v56 }
 0x395   : > { %v2595_v8 = vadd.f32 %v4700_v49, %v2559_v46  ;;  %2461 = vmatmul.bf16.vlgmr.msra.gmra.mxu1 %v3269_v9  ;;  %2536 = vmatmul.bf16.gmra.mxu3 %v3509_v60  ;;  %v2414_v35 = vadd.f32 %v2413_v62, %v2325_v32 }
 0x396   : > { %v2415_v10 = vpop.f32.mrf.mxu2 }
 0x397   : > { %v2627_v14 = vmax.f32 %v2595_v8, 0.0 }
 0x398   : > { %v2497_v15 = vpop.f32.mrf.mxu3 }
 0x399   : > { %v4015_v18 = vpack.c.bf16 %v2627_v14, %v2626_v13  ;;  %v2498_v21 = vadd.f32 %v2497_v15, %v2409_v17  ;;  %v2255_v9 = vpop.f32.mrf.mxu0 }
 0x39a   : > { %v2326_v7 = vpop.f32.mrf.mxu1 }
 0x39b   : > { %4093 = vst [vmem:[%s4712_s21 + $0x30] sm:$0xff] %v4015_v18   ;;  %v2560_v11 = vmul.f32 %v4692_v43, %v2498_v21  ;;  %v2327_v33 = vadd.f32 %v2326_v7, %v4743_v5 }
 0x39d   : > { %v2596_v31 = vadd.f32 %v4700_v49, %v2560_v11  ;;  %v2416_v58 = vadd.f32 %v2415_v10, %v2327_v33 }
 0x39e   : > { %v2418_v19 = vpop.f32.mrf.mxu2 }
 0x39f   : > { %v2628_v24 = vmax.f32 %v2596_v31, 0.0 }
 0x3a0   : > { %v2499_v51 = vpop.f32.mrf.mxu3 }
 0x3a1   : > { %v2500_v29 = vadd.f32 %v2499_v51, %v2411_v26 }
 0x3a2   : > { %v2329_v30 = vpop.f32.mrf.mxu1 }
 0x3a3   : > { %v2561_v34 = vmul.f32 %v4692_v43, %v2500_v29  ;;  %v2330_v27 = vadd.f32 %v2329_v30, %v4748_v37 }
 0x3a5   : > { %v2597_v12 = vadd.f32 %v4700_v49, %v2561_v34  ;;  %v2419_v62 = vadd.f32 %v2418_v19, %v2330_v27 }
 0x3a6   : > { %v2420_v36 = vpop.f32.mrf.mxu2 }
 0x3a7   : > { %v2629_v38 = vmax.f32 %v2597_v12, 0.0 }
 0x3a8   : > { %v2502_v39 = vpop.f32.mrf.mxu3 }
 0x3a9   : > { %v4020_v3 = vpack.c.bf16 %v2629_v38, %v2628_v24  ;;  %v2503_v44 = vadd.f32 %v2502_v39, %v2414_v35 }
 0x3aa   : > { %v2331_v41 = vpop.f32.mrf.mxu1 }
 0x3ab   : > { %4094 = vst [vmem:[%s4712_s21 + $0x38] sm:$0xff] %v4020_v3   ;;  %v2562_v45 = vmul.f32 %v4692_v43, %v2503_v44  ;;  %v2332_v2 = vadd.f32 %v2331_v41, %v4754_v54  ;;  %v2257_v54 = vpop.f32.mrf.mxu0 }
 0x3ad   : > { %v2598_v50 = vadd.f32 %v4700_v49, %v2562_v45  ;;  %v2421_v60 = vadd.f32 %v2420_v36, %v2332_v2 }
 0x3ae   : > { %v2423_v42 = vpop.f32.mrf.mxu2 }
 0x3af   : > { %v2630_v5 = vmax.f32 %v2598_v50, 0.0 }
 0x3b0   : > { %v2504_v47 = vpop.f32.mrf.mxu3 }
 0x3b1   : > { %v2505_v56 = vadd.f32 %v2504_v47, %v2416_v58 }
 0x3b2   : > { %v2334_v52 = vpop.f32.mrf.mxu1 }
 0x3b3   : > { %v2563_v55 = vmul.f32 %v4692_v43, %v2505_v56  ;;  %v2335_v13 = vadd.f32 %v2334_v52, %v4761_v4  ;;  %v2260_v30 = vpop.f32.mrf.mxu0 }
 0x3b5   : > { %v2599_v63 = vadd.f32 %v4700_v49, %v2563_v55  ;;  %v2424_v7 = vadd.f32 %v2423_v42, %v2335_v13 }
 0x3b6   : > { %v2425_v59 = vpop.f32.mrf.mxu2 }
 0x3b7   : > { %v2631_v57 = vmax.f32 %v2599_v63, 0.0 }
 0x3b8   : > { %v2507_v23 = vpop.f32.mrf.mxu3 }
 0x3b9   : > { %v4025_v0 = vpack.c.bf16 %v2631_v57, %v2630_v5  ;;  %v2508_v53 = vadd.f32 %v2507_v23, %v2419_v62 }
 0x3ba   : > { %v2336_v1 = vpop.f32.mrf.mxu1 }
 0x3bb   : > { %4095 = vst [vmem:[%s4712_s21 + $0x40] sm:$0xff] %v4025_v0   ;;  %v2564_v61 = vmul.f32 %v4692_v43, %v2508_v53  ;;  %v2337_v19 = vadd.f32 %v2336_v1, %v2247_v22  ;;  %v2262_v33 = vpop.f32.mrf.mxu0 }
 0x3bd   : > { %v2600_v8 = vadd.f32 %v4700_v49, %v2564_v61  ;;  %v2426_v51 = vadd.f32 %v2425_v59, %v2337_v19 }
 0x3be   : > { %v2428_v6 = vpop.f32.mrf.mxu2 }
 0x3bf   : > { %v2632_v15 = vmax.f32 %v2600_v8, 0.0 }
 0x3c0   : > { %v2509_v40 = vpop.f32.mrf.mxu3 }
 0x3c1   : > { %v2510_v37 = vadd.f32 %v2509_v40, %v2421_v60 }
 0x3c2   : > { %v2339_v46 = vpop.f32.mrf.mxu1 }
 0x3c3   : > { %v2565_v10 = vmul.f32 %v4692_v43, %v2510_v37  ;;  %v2340_v36 = vadd.f32 %v2339_v46, %v2250_v28  ;;  %v2265_v63 = vpop.f32.mrf.mxu0 }
 0x3c5   : > { %v2601_v14 = vadd.f32 %v4700_v49, %v2565_v10  ;;  %v2429_v3 = vadd.f32 %v2428_v6, %v2340_v36 }
 0x3c6   : > { %v2430_v11 = vpop.f32.mrf.mxu2 }
 0x3c7   : > { %v2633_v17 = vmax.f32 %v2601_v14, 0.0 }
 0x3c8   : > { %v2512_v18 = vpop.f32.mrf.mxu3 }
 0x3c9   : > { %v4030_v20 = vpack.c.bf16 %v2633_v17, %v2632_v15  ;;  %v2513_v26 = vadd.f32 %v2512_v18, %v2424_v7 }
 0x3ca   : > { %v2341_v21 = vpop.f32.mrf.mxu1 }
 0x3cb   : > { %4096 = vst [vmem:[%s4712_s21 + $0x48] sm:$0xff] %v4030_v20   ;;  %v2566_v29 = vmul.f32 %v4692_v43, %v2513_v26  ;;  %v2342_v42 = vadd.f32 %v2341_v21, %v2252_v48  ;;  %v2267_v61 = vpop.f32.mrf.mxu0 }
 0x3cd   : > { %v2602_v32 = vadd.f32 %v4700_v49, %v2566_v29  ;;  %v2431_v45 = vadd.f32 %v2430_v11, %v2342_v42 }
 0x3ce   : > { %v2433_v38 = vpop.f32.mrf.mxu2 }
 0x3cf   : > { %v2634_v22 = vmax.f32 %v2602_v32, 0.0 }
 0x3d0   : > { %v2514_v31 = vpop.f32.mrf.mxu3 }
 0x3d1   : > { %v2515_v4 = vadd.f32 %v2514_v31, %v2426_v51 }
 0x3d2   : > { %v2344_v34 = vpop.f32.mrf.mxu1 }
 0x3d3   : > { %v2567_v12 = vmul.f32 %v4692_v43, %v2515_v4  ;;  %v2345_v5 = vadd.f32 %v2344_v34, %v2255_v9  ;;  %v2270_v18 = vpop.f32.mrf.mxu0 }
 0x3d5   : > { %v2603_v24 = vadd.f32 %v4700_v49, %v2567_v12  ;;  %v2434_v62 = vadd.f32 %v2433_v38, %v2345_v5 }
 0x3d6   : > { %v2435_v52 = vpop.f32.mrf.mxu2 }
 0x3d7   : > { %v2635_v39 = vmax.f32 %v2603_v24, 0.0 }
 0x3d8   : > { %v2517_v35 = vpop.f32.mrf.mxu3 }
 0x3d9   : > { %v4035_v41 = vpack.c.bf16 %v2635_v39, %v2634_v22  ;;  %v2518_v58 = vadd.f32 %v2517_v35, %v2429_v3 }
 0x3da   : > { %v2346_v44 = vpop.f32.mrf.mxu1 }
 0x3db   : > { %4097 = vst [vmem:[%s4712_s21 + $0x50] sm:$0xff] %v4035_v41   ;;  %v2568_v47 = vmul.f32 %v4692_v43, %v2518_v58  ;;  %v2347_v53 = vadd.f32 %v2346_v44, %v2257_v54 }
 0x3dd   : > { %v2604_v55 = vadd.f32 %v4700_v49, %v2568_v47  ;;  %v2436_v40 = vadd.f32 %v2435_v52, %v2347_v53 }
 0x3de   : > { %v2438_v1 = vpop.f32.mrf.mxu2 }
 0x3df   : > { %v2636_v23 = vmax.f32 %v2604_v55, 0.0 }
 0x3e0   : > { %v2519_v56 = vpop.f32.mrf.mxu3 }
 0x3e1   : > { %v2520_v28 = vadd.f32 %v2519_v56, %v2431_v45 }
 0x3e2   : > { %v2349_v50 = vpop.f32.mrf.mxu1 }
 0x3e3   : > { %v2569_v27 = vmul.f32 %v4692_v43, %v2520_v28  ;;  %v2350_v14 = vadd.f32 %v2349_v50, %v2260_v30  ;;  %v2272_v30 = vpop.f32.mrf.mxu0 }
 0x3e5   : > { %v2605_v57 = vadd.f32 %v4700_v49, %v2569_v27  ;;  %v2439_v20 = vadd.f32 %v2438_v1, %v2350_v14 }
 0x3e6   : > { %v2440_v13 = vpop.f32.mrf.mxu2 }
 0x3e7   : > { %v2637_v48 = vmax.f32 %v2605_v57, 0.0 }
 0x3e8   : > { %v2522_v59 = vpop.f32.mrf.mxu3 }
 0x3e9   : > { %v4040_v0 = vpack.c.bf16 %v2637_v48, %v2636_v23  ;;  %v2523_v60 = vadd.f32 %v2522_v59, %v2434_v62 }
 0x3ea   : > { %v2351_v2 = vpop.f32.mrf.mxu1 }
 0x3eb   : > { %4098 = vst [vmem:[%s4712_s21 + $0x58] sm:$0xff] %v4040_v0   ;;  %v2570_v37 = vmul.f32 %v4692_v43, %v2523_v60  ;;  %v2352_v26 = vadd.f32 %v2351_v2, %v2262_v33  ;;  %v2373_v45 = vpop.f32.mrf.mxu0 }
 0x3ec   : > { %v2374_v27 = vadd.f32 %v2373_v45, %v4674_v16 }
 0x3ed   : > { %v2606_v8 = vadd.f32 %v4700_v49, %v2570_v37  ;;  %v2441_v29 = vadd.f32 %v2440_v13, %v2352_v26 }
 0x3ee   : > { %v2443_v51 = vpop.f32.mrf.mxu2 }
 0x3ef   : > { %v2638_v17 = vmax.f32 %v2606_v8, 0.0 }
 0x3f0   : > { %v2524_v46 = vpop.f32.mrf.mxu3 }
 0x3f1   : > { %v2525_v6 = vadd.f32 %v2524_v46, %v2436_v40 }
 0x3f2   : > { %v2354_v9 = vpop.f32.mrf.mxu1 }
 0x3f3   : > { %v2571_v10 = vmul.f32 %v4692_v43, %v2525_v6  ;;  %v2355_v24 = vadd.f32 %v2354_v9, %v2265_v63  ;;  %v2375_v59 = vpop.f32.mrf.mxu0 }
 0x3f4   : > { %v2376_v2 = vadd.f32 %v2375_v59, %v4677_v25 }
 0x3f5   : > { %v2607_v15 = vadd.f32 %v4700_v49, %v2571_v10  ;;  %v2444_v41 = vadd.f32 %v2443_v51, %v2355_v24 }
 0x3f6   : > { %v2445_v35 = vpop.f32.mrf.mxu2 }
 0x3f7   : > { %v2639_v54 = vmax.f32 %v2607_v15, 0.0 }
 0x3f8   : > { %v2527_v7 = vpop.f32.mrf.mxu3 }
 0x3f9   : > { %v4045_v21 = vpack.c.bf16 %v2639_v54, %v2638_v17  ;;  %v2528_v11 = vadd.f32 %v2527_v7, %v2439_v20 }
 0x3fa   : > { %v2356_v19 = vpop.f32.mrf.mxu1 }
 0x3fb   : > { %4099 = vst [vmem:[%s4712_s21 + $0x60] sm:$0xff] %v4045_v21   ;;  %v2572_v31 = vmul.f32 %v4692_v43, %v2528_v11  ;;  %v2357_v42 = vadd.f32 %v2356_v19, %v2267_v61 }
 0x3fd   : > { %v2608_v12 = vadd.f32 %v4700_v49, %v2572_v31  ;;  %v2446_v47 = vadd.f32 %v2445_v35, %v2357_v42 }
 0x3fe   : > { %v2448_v50 = vpop.f32.mrf.mxu2 }
 0x3ff   : > { %v2640_v22 = vmax.f32 %v2608_v12, 0.0 }
 0x400   : > { %v2529_v4 = vpop.f32.mrf.mxu3 }
 0x401   : > { %v2530_v34 = vadd.f32 %v2529_v4, %v2441_v29 }
 0x402   : > { %v2359_v32 = vpop.f32.mrf.mxu1 }
 0x403   : > { %v2573_v36 = vmul.f32 %v4692_v43, %v2530_v34  ;;  %v2360_v57 = vadd.f32 %v2359_v32, %v2270_v18 }
 0x405   : > { %v2609_v38 = vadd.f32 %v4700_v49, %v2573_v36  ;;  %v2449_v53 = vadd.f32 %v2448_v50, %v2360_v57 }
 0x406   : > { %v2450_v6 = vpop.f32.mrf.mxu2 }
 0x407   : > { %v2641_v39 = vmax.f32 %v2609_v38, 0.0 }
 0x408   : > { %v2532_v3 = vpop.f32.mrf.mxu3 }
 0x409   : > { %v4050_v33 = vpack.c.bf16 %v2641_v39, %v2640_v22  ;;  %v2533_v58 = vadd.f32 %v2532_v3, %v2444_v41 }
 0x40a   : > { %v2361_v44 = vpop.f32.mrf.mxu1 }
 0x40b   : > { %4100 = vst [vmem:[%s4712_s21 + $0x68] sm:$0xff] %v4050_v33   ;;  %v2574_v56 = vmul.f32 %v4692_v43, %v2533_v58  ;;  %v2362_v40 = vadd.f32 %v2361_v44, %v2272_v30 }
 0x40d   : > { %v2610_v63 = vadd.f32 %v4700_v49, %v2574_v56  ;;  %v2451_v10 = vadd.f32 %v2450_v6, %v2362_v40 }
 0x40f   : > { %v2642_v62 = vmax.f32 %v2610_v63, 0.0 }
 0x410   : > { %v2534_v52 = vpop.f32.mrf.mxu3 }
 0x411   : > { %v2535_v28 = vadd.f32 %v2534_v52, %v2446_v47 }
 0x412   : > { %v2462_v55 = vpop.f32.mrf.mxu1 }
 0x413   : > { %v2575_v5 = vmul.f32 %v4692_v43, %v2535_v28  ;;  %v2463_v48 = vadd.f32 %v2462_v55, %v2374_v27 }
 0x415   : > { %v2611_v23 = vadd.f32 %v4700_v49, %v2575_v5  ;;  %v2546_v16 = vmul.f32 %v4692_v43, %v2463_v48 }
 0x417   : > { %v2643_v0 = vmax.f32 %v2611_v23, 0.0  ;;  %v2582_v9 = vadd.f32 %v4700_v49, %v2546_v16 }
 0x418   : > { %v2537_v1 = vpop.f32.mrf.mxu3 }
 0x419   : > { %v4055_v60 = vpack.c.bf16 %v2643_v0, %v2642_v62  ;;  %v2538_v37 = vadd.f32 %v2537_v1, %v2449_v53  ;;  %v2614_v15 = vmax.f32 %v2582_v9, 0.0 }
 0x41a   : > { %v2464_v61 = vpop.f32.mrf.mxu1 }
 0x41b   : > { %4101 = vst [vmem:[%s4712_s21 + $0x70] sm:$0xff] %v4055_v60   ;;  %v2465_v46 = vadd.f32 %v2464_v61, %v2376_v2  ;;  %v2576_v13 = vmul.f32 %v4692_v43, %v2538_v37 }
 0x41d   : > { %v2547_v8 = vmul.f32 %v4692_v43, %v2465_v46  ;;  %v2612_v18 = vadd.f32 %v4700_v49, %v2576_v13 }
 0x41f   : > { %v2583_v25 = vadd.f32 %v4700_v49, %v2547_v8  ;;  %v2644_v19 = vmax.f32 %v2612_v18, 0.0 }
 0x420   : > { %v2539_v14 = vpop.f32.mrf.mxu3 }
 0x421   : > { %v2615_v17 = vmax.f32 %v2583_v25, 0.0  ;;  %v2540_v54 = vadd.f32 %v2539_v14, %v2451_v10 }
 0x423   : > { %v3985_v7 = vpack.c.bf16 %v2615_v17, %v2614_v15  ;;  %v2577_v20 = vmul.f32 %v4692_v43, %v2540_v54 }
 0x425   : > { %3986 = vst [vmem:[%s4712_s21] sm:$0xff] %v3985_v7   ;;  %v2613_v21 = vadd.f32 %v4700_v49, %v2577_v20 }
 0x427   : > { %v2645_v26 = vmax.f32 %v2613_v21, 0.0 }
 0x429   : > { %v4060_v11 = vpack.c.bf16 %v2645_v26, %v2644_v19 }
 0x42b   : > { %4102 = vst [vmem:[%s4712_s21 + $0x78] sm:$0xff] %v4060_v11  }
 0x42c   : > { %4275 = shalt.err (!%p4272_p8)
}
 0x42d   : > { %s4327_s2 = smov 64   ;;  %s4328_s21 = smov 4  }
 0x42e   : > { %4127 = dma.vmem_to_hbm [thread:$0]  (%p4417_p5), %s2724_s13, 2048, %s2726_s14, %s2711_s16, %s4327_s2, %s4327_s2, %s4328_s21  }
 0x42f PF: > { %p4144_p9 = scmp.ge.s32.totalorder %s4318_s12, 2  ;;  %s2740_s28 = sand.u32 1, %s4306_s30  }
 0x430   : > { %s2741_s29 = scalar_lea.sflag [#allocation5], %s2740_s28 }
 0x431   : > { %p4137_p10 = pnand %p4144_p9, %p4421_p6 }
 0x433   : > { %p4138_p11 = pneg %p4137_p10 }
 0x435   : > { %4301 = dma.done.wait (%p4138_p11), %s2741_s29, 2048  }
 0x436   : > { %4303 = vsyncadd (%p4138_p11), %s2741_s29, 4294965248  ;;  %p21_p12 = scmp.ge.s32.totalorder %s4404_s15, 4   ;;  %s4873_s30 = smov %s4310_s10 }
 0x437   : > { %s4874_s10 = smov %s4314_s11  ;;  %s4875_s11 = smov %s4415_s18 }
 0x438   : > { %s4876_s12 = smov %s4404_s15  ;;  %23 = sbr.rel (!%p21_p12) target bundleno = 7 (0x7), region = 100 }
 0x43d   :  { %2747 = vsyncpa [#allocation4], 1 }
 0x43e   :  { %2749 = vsyncpa [#allocation4 + $0x1], 1 }
 0x43f   :  { %2750 = vsyncpa [#allocation7], 1 }
 0x440   :  { %2751 = vsyncpa [#allocation5], 1 }
 0x441   :  { %2753 = vsyncpa [#allocation5 + $0x1], 1 }

</bundles_post_ra>
